<compile_context>
chip_gen: v7x
topology: tpu7x:2x2x1
jax: 0.10.0
libtpu: 0.0.40
codegen_flags: <defaults>
</compile_context>

<pallas_src>
import functools

import jax
import jax.numpy as jnp
from jax.experimental import pallas as pl
from jax.experimental.pallas import tpu as pltpu

LN_EPS = 1e-5
OUT_PAD = 128  # classifier output lane padding (full-lane store)


def _layernorm(x, g, b):
    mu = jnp.mean(x, axis=-1, keepdims=True)
    var = jnp.mean((x - mu) ** 2, axis=-1, keepdims=True)
    return (x - mu) * jax.lax.rsqrt(var + LN_EPS) * g + b


def _gelu_new(x):
    # GPT-2's "gelu_new" (tanh approximation)
    c = 0.7978845608028654  # sqrt(2/pi)
    return 0.5 * x * (1.0 + jnp.tanh(c * (x + 0.044715 * x * x * x)))


def gpt2_layer_kernel(x_ref, mask_ref,
                      ln1_g, ln1_b, wqkv, bqkv, wproj, bproj,
                      ln2_g, ln2_b, wfc, bfc, wmp, bmp,
                      lnf_g, lnf_b, w1, b1, w2, b2,
                      o_ref, x2d_ref, *, n_head):
    """One grid step = one transformer layer on one batch block of pairs."""
    layer = pl.program_id(1)
    n_layer = pl.num_programs(1)

    bb2, S, H = x_ref.shape           # bb2 = 2 * pairs_per_block
    rows = bb2 * S
    hd = H // n_head
    pb = o_ref.shape[1]               # pairs per block
    bf16 = jnp.bfloat16

    # Initialize the (persistent) f32 residual stream at the first layer.
    @pl.when(layer == 0)
    def _():
        x2d_ref[...] = x_ref[...].reshape(rows, H)

    mask = mask_ref[0]                                            # [bb2, S] f32

    # Split additive attention bias: shared causal [1,S,S] + padding [bb2,1,S]
    # (never materialize the combined [2B,S,S] tensor).
    r = jax.lax.broadcasted_iota(jnp.int32, (S, S), 0)
    c = jax.lax.broadcasted_iota(jnp.int32, (S, S), 1)
    causal_bias = jnp.where(r >= c, 0.0, -1e9)[None, :, :]        # [1,S,S]
    pad_bias = jnp.where(mask > 0.5, 0.0, -1e9)[:, None, :]       # [bb2,1,S]

    x2d = x2d_ref[...]                                            # [rows,H] f32

    # ---- causal multi-head self-attention ----
    h = _layernorm(x2d, ln1_g[0], ln1_b[0])
    qkv = jnp.dot(h.astype(bf16), wqkv[0],
                  preferred_element_type=jnp.float32) + bqkv[0]   # [rows,3H] f32
    scale = 1.0 / float(hd) ** 0.5
    qs = (qkv[:, 0:H] * scale).astype(bf16)      # fold 1/sqrt(hd) into q
    ks = qkv[:, H:2 * H].astype(bf16)
    vs = qkv[:, 2 * H:3 * H].astype(bf16)

    heads = []
    for hh in range(n_head):          # static unroll; einsums batch over bb2
        q = qs[:, hh * hd:(hh + 1) * hd].reshape(bb2, S, hd)
        k = ks[:, hh * hd:(hh + 1) * hd].reshape(bb2, S, hd)
        v = vs[:, hh * hd:(hh + 1) * hd].reshape(bb2, S, hd)
        s = jnp.einsum("bqd,bkd->bqk", q, k,
                       preferred_element_type=jnp.float32)        # f32 scores
        s = s + causal_bias + pad_bias
        s = s - jnp.max(s, axis=-1, keepdims=True)
        p = jnp.exp(s)
        p = p * pl.reciprocal(jnp.sum(p, axis=-1, keepdims=True), approx=True)
        oh = jnp.einsum("bqk,bkd->bqd", p.astype(bf16), v,
                        preferred_element_type=jnp.float32)
        heads.append(oh.reshape(rows, hd))
    attn = jnp.concatenate(heads, axis=-1)                        # [rows,H] f32

    x2d = x2d + jnp.dot(attn.astype(bf16), wproj[0],
                        preferred_element_type=jnp.float32) + bproj[0]

    # ---- MLP ----
    h2 = _layernorm(x2d, ln2_g[0], ln2_b[0])
    ff = _gelu_new(jnp.dot(h2.astype(bf16), wfc[0],
                           preferred_element_type=jnp.float32) + bfc[0])
    x2d = x2d + jnp.dot(ff.astype(bf16), wmp[0],
                        preferred_element_type=jnp.float32) + bmp[0]
    x2d_ref[...] = x2d

    # ---- final LN + masked mean pooling + classifier head (last layer) ----
    @pl.when(layer == n_layer - 1)
    def _():
        hf = _layernorm(x2d, lnf_g[...], lnf_b[...]).reshape(bb2, S, H)
        denom = jnp.maximum(jnp.sum(mask, axis=1, keepdims=True), 1.0)  # /0 guard
        pooled = jnp.sum(hf * mask[:, :, None], axis=1) / denom         # [bb2,H]
        p1 = pooled[:pb].astype(bf16)        # sentence-1 pooled states [pb,H]
        p2 = pooled[pb:].astype(bf16)        # sentence-2 pooled states [pb,H]
        W1 = w1[...]
        # concat(p1, p2) @ W1 == p1 @ W1[:H] + p2 @ W1[H:]
        z = (jnp.dot(p1, W1[0:H, :], preferred_element_type=jnp.float32)
             + jnp.dot(p2, W1[H:2 * H, :], preferred_element_type=jnp.float32)
             + b1[...])
        z = jnp.maximum(z, 0.0)              # ReLU (dropout = identity at eval)
        o_ref[0] = (jnp.dot(z.astype(bf16), w2[...],
                            preferred_element_type=jnp.float32) + b2[...])


def run_model(x, mask3, params, n_head):
    """x: [2B,S,H] f32 (pairs packed per block); mask3: [nb, 2*pb, S] f32."""
    nb, bb2, S = mask3.shape
    pb = bb2 // 2
    H = x.shape[-1]
    L = params["wqkv"].shape[0]
    num_labels = params["cls_w2"].shape[-1]

    # Pad the classifier output lanes to 128 (unmasked full-lane stores).
    w2p = jnp.pad(params["cls_w2"], ((0, 0), (0, OUT_PAD - num_labels)))
    b2p = jnp.pad(params["cls_b2"], ((0, 0), (0, OUT_PAD - num_labels)))

    args = (x, mask3,
            params["ln1_g"], params["ln1_b"], params["wqkv"], params["bqkv"],
            params["wproj"], params["bproj"], params["ln2_g"], params["ln2_b"],
            params["wfc"], params["bfc"], params["wmp"], params["bmp"],
            params["lnf_g"], params["lnf_b"],
            params["cls_w1"], params["cls_b1"], w2p, b2p)

    def layer3(a):    # per-layer stacked [L, r, c]: stream one layer per step
        return pl.BlockSpec((1,) + a.shape[1:], lambda b, l: (l, 0, 0))

    def shared2(a):   # layer-independent [r, c]: same (resident) block
        return pl.BlockSpec(a.shape, lambda b, l: (0, 0))

    in_specs = [
        pl.BlockSpec((bb2, S, H), lambda b, l: (b, 0, 0)),   # x, per batch block
        pl.BlockSpec((1, bb2, S), lambda b, l: (b, 0, 0)),   # mask, per batch block
        layer3(params["ln1_g"]), layer3(params["ln1_b"]),
        layer3(params["wqkv"]), layer3(params["bqkv"]),
        layer3(params["wproj"]), layer3(params["bproj"]),
        layer3(params["ln2_g"]), layer3(params["ln2_b"]),
        layer3(params["wfc"]), layer3(params["bfc"]),
        layer3(params["wmp"]), layer3(params["bmp"]),
        shared2(params["lnf_g"]), shared2(params["lnf_b"]),
        shared2(params["cls_w1"]), shared2(params["cls_b1"]),
        shared2(w2p), shared2(b2p),
    ]

    grid_spec = pltpu.PrefetchScalarGridSpec(
        num_scalar_prefetch=0,
        grid=(nb, L),                            # (batch blocks, layers)
        in_specs=in_specs,
        out_specs=pl.BlockSpec((1, pb, OUT_PAD), lambda b, l: (b, 0, 0)),
        scratch_shapes=[pltpu.VMEM((bb2 * S, H), jnp.float32)],  # residual stream
    )
    out = pl.pallas_call(
        functools.partial(gpt2_layer_kernel, n_head=n_head),
        grid_spec=grid_spec,
        out_shape=jax.ShapeDtypeStruct((nb, pb, OUT_PAD), jnp.float32),
        compiler_params=pltpu.CompilerParams(
            # batch blocks parallel (v7x 2nd TC), layer axis carries the
            # residual-stream dependency.
            dimension_semantics=("parallel", "arbitrary"),
            # Toy-sized budget; at real GPT-2 scale re-derive per generation
            # (2x-buffered per-layer bf16 weights + activations, < 64 MiB v7x).
            vmem_limit_bytes=32 * 1024 * 1024,
        ),
    )(*args)
    return out.reshape(nb * pb, OUT_PAD)[:, :num_labels]


@functools.partial(jax.jit, static_argnums=(1, 2))
def forward(params, n_head, n_batch_blocks, ids1, m1, ids2, m2):
    B, S = ids1.shape
    nb = n_batch_blocks
    pb = B // nb
    # Pack so every batch block holds complete sentence pairs:
    # rows [j*2pb : j*2pb+pb] = sentence-1 of pairs j*pb.., next pb = sentence-2.
    ids = jnp.stack([ids1.reshape(nb, pb, S), ids2.reshape(nb, pb, S)],
                    axis=1).reshape(2 * B, S)
    mask3 = jnp.stack([m1.reshape(nb, pb, S), m2.reshape(nb, pb, S)],
                      axis=1).astype(jnp.float32).reshape(nb, 2 * pb, S)
    # Embedding lookup (gather) — plain JAX glue outside the kernel.
    x = params["wte"][ids] + params["wpe"][:S][None, :, :]       # [2B,S,H] f32
    return run_model(x, mask3, params, n_head)


def init_params(key, vocab=64, max_pos=16, hidden=32, n_layer=2,
                linear_h=16, num_labels=2):
    keys = jax.random.split(key, 8)
    k_wte, k_wpe, k_w1, k_w2, k_qkv, k_proj, k_fc, k_mp = keys
    s = 0.02
    bf16 = jnp.bfloat16

    def nrm(k, shape, dtype=jnp.float32):
        return (s * jax.random.normal(k, shape, jnp.float32)).astype(dtype)

    L, H = n_layer, hidden
    return {
        # embeddings stay f32 (used outside the kernel)
        "wte": nrm(k_wte, (vocab, H)),
        "wpe": nrm(k_wpe, (max_pos, H)),
        # per-layer weights stacked along a leading L axis (streamed per layer);
        # matmul weights stored in bf16 (halves HBM->VMEM bytes, fast MXU path),
        # LN params and biases stay f32.
        "ln1_g": jnp.ones((L, 1, H), jnp.float32),
        "ln1_b": jnp.zeros((L, 1, H), jnp.float32),
        "wqkv": nrm(k_qkv, (L, H, 3 * H), bf16),
        "bqkv": jnp.zeros((L, 1, 3 * H), jnp.float32),
        "wproj": nrm(k_proj, (L, H, H), bf16),
        "bproj": jnp.zeros((L, 1, H), jnp.float32),
        "ln2_g": jnp.ones((L, 1, H), jnp.float32),
        "ln2_b": jnp.zeros((L, 1, H), jnp.float32),
        "wfc": nrm(k_fc, (L, H, 4 * H), bf16),
        "bfc": jnp.zeros((L, 1, 4 * H), jnp.float32),
        "wmp": nrm(k_mp, (L, 4 * H, H), bf16),
        "bmp": jnp.zeros((L, 1, H), jnp.float32),
        # final LN + classifier head
        "lnf_g": jnp.ones((1, H), jnp.float32),
        "lnf_b": jnp.zeros((1, H), jnp.float32),
        "cls_w1": nrm(k_w1, (2 * H, linear_h), bf16),
        "cls_b1": jnp.zeros((1, linear_h), jnp.float32),
        "cls_w2": nrm(k_w2, (linear_h, num_labels), bf16),
        "cls_b2": jnp.zeros((1, num_labels), jnp.float32),
    }


if __name__ == "__main__":
    key = jax.random.PRNGKey(0)
    pkey, dkey = jax.random.split(key)

    # small synthetic config: hidden=32, n_head=2, n_layer=2, linear_h=16
    HIDDEN, N_HEAD, N_LAYER, LINEAR_H, NUM_LABELS, VOCAB = 32, 2, 2, 16, 2, 64
    params = init_params(pkey, vocab=VOCAB, max_pos=16, hidden=HIDDEN,
                         n_layer=N_LAYER, linear_h=LINEAR_H,
                         num_labels=NUM_LABELS)

    B, S = 2, 8
    N_BATCH_BLOCKS = 2          # "parallel" grid axis (feeds both v7x TCs)
    k1, k2 = jax.random.split(dkey)
    input_ids_1 = jax.random.randint(k1, (B, S), 0, VOCAB, dtype=jnp.int32)
    input_ids_2 = jax.random.randint(k2, (B, S), 0, VOCAB, dtype=jnp.int32)
    attention_mask_1 = jnp.array([[1] * 8, [1] * 5 + [0] * 3], jnp.int32)
    attention_mask_2 = jnp.array([[1] * 6 + [0] * 2, [1] * 8], jnp.int32)

    logits = forward(params, N_HEAD, N_BATCH_BLOCKS,
                     input_ids_1, attention_mask_1,
                     input_ids_2, attention_mask_2)
    logits = jax.block_until_ready(logits)
    assert logits.shape == (B, NUM_LABELS)
    assert bool(jnp.all(jnp.isfinite(logits)))
    print("KERNEL_OK")
</pallas_src>

<mosaic_0001>
module attributes {stable_mosaic.version = 11 : i64} {
  func.func @gpt2_layer_kernel(%arg0: i32, %arg1: i32, %arg2: memref<2x8x32xf32, #tpu.memory_space<vmem>>, %arg3: memref<1x2x8xf32, #tpu.memory_space<vmem>>, %arg4: memref<1x1x32xf32, #tpu.memory_space<vmem>>, %arg5: memref<1x1x32xf32, #tpu.memory_space<vmem>>, %arg6: memref<1x32x96xbf16, #tpu.memory_space<vmem>>, %arg7: memref<1x1x96xf32, #tpu.memory_space<vmem>>, %arg8: memref<1x32x32xbf16, #tpu.memory_space<vmem>>, %arg9: memref<1x1x32xf32, #tpu.memory_space<vmem>>, %arg10: memref<1x1x32xf32, #tpu.memory_space<vmem>>, %arg11: memref<1x1x32xf32, #tpu.memory_space<vmem>>, %arg12: memref<1x32x128xbf16, #tpu.memory_space<vmem>>, %arg13: memref<1x1x128xf32, #tpu.memory_space<vmem>>, %arg14: memref<1x128x32xbf16, #tpu.memory_space<vmem>>, %arg15: memref<1x1x32xf32, #tpu.memory_space<vmem>>, %arg16: memref<1x32xf32, #tpu.memory_space<vmem>>, %arg17: memref<1x32xf32, #tpu.memory_space<vmem>>, %arg18: memref<64x16xbf16, #tpu.memory_space<vmem>>, %arg19: memref<1x16xf32, #tpu.memory_space<vmem>>, %arg20: memref<16x128xbf16, #tpu.memory_space<vmem>>, %arg21: memref<1x128xf32, #tpu.memory_space<vmem>>, %arg22: memref<1x1x128xf32, #tpu.memory_space<vmem>>, %arg23: memref<16x32xf32, #tpu.memory_space<vmem>>) attributes {dimension_semantics = [#tpu.dimension_semantics<parallel>, #tpu.dimension_semantics<arbitrary>], iteration_bounds = array<i64: 2, 2>, scalar_prefetch = 0 : i64, scratch_operands = 1 : i64, tpu.core_type = #tpu.core_type<tc>, window_params = [{transform_indices = @transform_0, window_bounds = array<i64: 2, 8, 32>}, {transform_indices = @transform_1, window_bounds = array<i64: 1, 2, 8>}, {transform_indices = @transform_2, window_bounds = array<i64: 1, 1, 32>}, {transform_indices = @transform_3, window_bounds = array<i64: 1, 1, 32>}, {transform_indices = @transform_4, window_bounds = array<i64: 1, 32, 96>}, {transform_indices = @transform_5, window_bounds = array<i64: 1, 1, 96>}, {transform_indices = @transform_6, window_bounds = array<i64: 1, 32, 32>}, {transform_indices = @transform_7, window_bounds = array<i64: 1, 1, 32>}, {transform_indices = @transform_8, window_bounds = array<i64: 1, 1, 32>}, {transform_indices = @transform_9, window_bounds = array<i64: 1, 1, 32>}, {transform_indices = @transform_10, window_bounds = array<i64: 1, 32, 128>}, {transform_indices = @transform_11, window_bounds = array<i64: 1, 1, 128>}, {transform_indices = @transform_12, window_bounds = array<i64: 1, 128, 32>}, {transform_indices = @transform_13, window_bounds = array<i64: 1, 1, 32>}, {pipeline_mode = #tpu.pipeline_mode<synchronous>, transform_indices = @transform_14, window_bounds = array<i64: 1, 32>}, {pipeline_mode = #tpu.pipeline_mode<synchronous>, transform_indices = @transform_15, window_bounds = array<i64: 1, 32>}, {pipeline_mode = #tpu.pipeline_mode<synchronous>, transform_indices = @transform_16, window_bounds = array<i64: 64, 16>}, {pipeline_mode = #tpu.pipeline_mode<synchronous>, transform_indices = @transform_17, window_bounds = array<i64: 1, 16>}, {pipeline_mode = #tpu.pipeline_mode<synchronous>, transform_indices = @transform_18, window_bounds = array<i64: 16, 128>}, {pipeline_mode = #tpu.pipeline_mode<synchronous>, transform_indices = @transform_19, window_bounds = array<i64: 1, 128>}, {transform_indices = @transform_20, window_bounds = array<i64: 1, 1, 128>}]} {
    %c0_i32 = arith.constant 0 : i32
    %0 = arith.cmpi eq, %arg1, %c0_i32 : i32
    %1 = arith.extui %0 : i1 to i32
    %c0_i32_0 = arith.constant 0 : i32
    %2 = arith.cmpi ne, %1, %c0_i32_0 : i32
    scf.if %2 {
      %c0_75 = arith.constant 0 : index
      %c0_76 = arith.constant 0 : index
      %c0_77 = arith.constant 0 : index
      %179 = vector.load %arg2[%c0_75, %c0_76, %c0_77] : memref<2x8x32xf32, #tpu.memory_space<vmem>>, vector<2x8x32xf32>
      %180 = vector.shape_cast %179 : vector<2x8x32xf32> to vector<16x32xf32>
      %c0_78 = arith.constant 0 : index
      %c0_79 = arith.constant 0 : index
      %181 = vector.load %arg23[%c0_78, %c0_79] : memref<16x32xf32, #tpu.memory_space<vmem>>, vector<16x32xf32>
      tpu.vector_store %arg23[%c0_78, %c0_79], %180 {strides = array<i32>} : memref<16x32xf32, #tpu.memory_space<vmem>>, vector<16x32xf32>,
    } else {
    }
    %c0 = arith.constant 0 : index
    %c0_1 = arith.constant 0 : index
    %c0_2 = arith.constant 0 : index
    %3 = vector.load %arg3[%c0, %c0_1, %c0_2] : memref<1x2x8xf32, #tpu.memory_space<vmem>>, vector<1x2x8xf32>
    %4 = vector.shape_cast %3 : vector<1x2x8xf32> to vector<2x8xf32>
    %5 = tpu.iota {dimensions = array<i32: 0>} : vector<8x8xi32>
    %6 = tpu.iota {dimensions = array<i32: 1>} : vector<8x8xi32>
    %7 = arith.cmpi sge, %5, %6 : vector<8x8xi32>
    %cst = arith.constant 0.000000e+00 : f32
    %cst_3 = arith.constant -1.000000e+09 : f32
    %8 = vector.broadcast %cst : f32 to vector<8x8xf32>
    %9 = vector.broadcast %cst_3 : f32 to vector<8x8xf32>
    %10 = arith.select %7, %8, %9 : vector<8x8xi1>, vector<8x8xf32>
    %11 = vector.shape_cast %10 : vector<8x8xf32> to vector<1x8x8xf32>
    %cst_4 = arith.constant 5.000000e-01 : f32
    %12 = vector.broadcast %cst_4 : f32 to vector<2x8xf32>
    %13 = arith.cmpf ogt, %4, %12 : vector<2x8xf32>
    %cst_5 = arith.constant 0.000000e+00 : f32
    %cst_6 = arith.constant -1.000000e+09 : f32
    %14 = vector.broadcast %cst_5 : f32 to vector<2x8xf32>
    %15 = vector.broadcast %cst_6 : f32 to vector<2x8xf32>
    %16 = arith.select %13, %14, %15 : vector<2x8xi1>, vector<2x8xf32>
    %17 = vector.shape_cast %16 : vector<2x8xf32> to vector<2x1x8xf32>
    %c0_7 = arith.constant 0 : index
    %c0_8 = arith.constant 0 : index
    %18 = vector.load %arg23[%c0_7, %c0_8] : memref<16x32xf32, #tpu.memory_space<vmem>>, vector<16x32xf32>
    %c0_9 = arith.constant 0 : index
    %c0_10 = arith.constant 0 : index
    %c0_11 = arith.constant 0 : index
    %19 = vector.load %arg4[%c0_9, %c0_10, %c0_11] : memref<1x1x32xf32, #tpu.memory_space<vmem>>, vector<1x1x32xf32>
    %20 = vector.shape_cast %19 : vector<1x1x32xf32> to vector<1x32xf32>
    %c0_12 = arith.constant 0 : index
    %c0_13 = arith.constant 0 : index
    %c0_14 = arith.constant 0 : index
    %21 = vector.load %arg5[%c0_12, %c0_13, %c0_14] : memref<1x1x32xf32, #tpu.memory_space<vmem>>, vector<1x1x32xf32>
    %22 = vector.shape_cast %21 : vector<1x1x32xf32> to vector<1x32xf32>
    %cst_15 = arith.constant dense<0.000000e+00> : vector<16xf32>
    %23 = vector.multi_reduction <add>, %18, %cst_15 [1] : vector<16x32xf32> to vector<16xf32>
    %24 = vector.shape_cast %23 : vector<16xf32> to vector<16x1xf32>
    %cst_16 = arith.constant 3.200000e+01 : f32
    %25 = vector.broadcast %cst_16 : f32 to vector<16x1xf32>
    %26 = arith.divf %24, %25 : vector<16x1xf32>
    %27 = vector.broadcast %26 : vector<16x1xf32> to vector<16x32xf32>
    %28 = arith.subf %18, %27 : vector<16x32xf32>
    %29 = arith.mulf %28, %28 : vector<16x32xf32>
    %cst_17 = arith.constant dense<0.000000e+00> : vector<16xf32>
    %30 = vector.multi_reduction <add>, %29, %cst_17 [1] : vector<16x32xf32> to vector<16xf32>
    %31 = vector.shape_cast %30 : vector<16xf32> to vector<16x1xf32>
    %cst_18 = arith.constant 3.200000e+01 : f32
    %32 = vector.broadcast %cst_18 : f32 to vector<16x1xf32>
    %33 = arith.divf %31, %32 : vector<16x1xf32>
    %34 = vector.broadcast %26 : vector<16x1xf32> to vector<16x32xf32>
    %35 = arith.subf %18, %34 : vector<16x32xf32>
    %cst_19 = arith.constant 9.99999974E-6 : f32
    %36 = vector.broadcast %cst_19 : f32 to vector<16x1xf32>
    %37 = arith.addf %33, %36 : vector<16x1xf32>
    %38 = math.rsqrt %37 : vector<16x1xf32>
    %39 = vector.broadcast %38 : vector<16x1xf32> to vector<16x32xf32>
    %40 = arith.mulf %35, %39 : vector<16x32xf32>
    %41 = vector.broadcast %20 : vector<1x32xf32> to vector<16x32xf32>
    %42 = arith.mulf %40, %41 : vector<16x32xf32>
    %43 = vector.broadcast %22 : vector<1x32xf32> to vector<16x32xf32>
    %44 = arith.addf %42, %43 : vector<16x32xf32>
    %45 = arith.truncf %44 : vector<16x32xf32> to vector<16x32xbf16>
    %c0_20 = arith.constant 0 : index
    %c0_21 = arith.constant 0 : index
    %c0_22 = arith.constant 0 : index
    %46 = vector.load %arg6[%c0_20, %c0_21, %c0_22] : memref<1x32x96xbf16, #tpu.memory_space<vmem>>, vector<1x32x96xbf16>
    %47 = vector.shape_cast %46 : vector<1x32x96xbf16> to vector<32x96xbf16>
    %cst_23 = arith.constant dense<0.000000e+00> : vector<16x96xf32>
    %48 = tpu.matmul %45, %47, %cst_23 {dimension_numbers = #tpu.dot_dimension_numbers<[1], [0], [0], [1], [0, 0, 1, 1], [], []>} : vector<16x32xbf16>, vector<32x96xbf16>, vector<16x96xf32> -> vector<16x96xf32>
    %c0_24 = arith.constant 0 : index
    %c0_25 = arith.constant 0 : index
    %c0_26 = arith.constant 0 : index
    %49 = vector.load %arg7[%c0_24, %c0_25, %c0_26] : memref<1x1x96xf32, #tpu.memory_space<vmem>>, vector<1x1x96xf32>
    %50 = vector.shape_cast %49 : vector<1x1x96xf32> to vector<1x96xf32>
    %51 = vector.broadcast %50 : vector<1x96xf32> to vector<16x96xf32>
    %52 = arith.addf %48, %51 : vector<16x96xf32>
    %53 = vector.extract_strided_slice %52 {offsets = [0, 0], sizes = [16, 32], strides = [1, 1]} : vector<16x96xf32> to vector<16x32xf32>
    %cst_27 = arith.constant 2.500000e-01 : f32
    %54 = vector.broadcast %cst_27 : f32 to vector<16x32xf32>
    %55 = arith.mulf %53, %54 : vector<16x32xf32>
    %56 = arith.truncf %55 : vector<16x32xf32> to vector<16x32xbf16>
    %57 = vector.extract_strided_slice %52 {offsets = [0, 32], sizes = [16, 32], strides = [1, 1]} : vector<16x96xf32> to vector<16x32xf32>
    %58 = arith.truncf %57 : vector<16x32xf32> to vector<16x32xbf16>
    %59 = vector.extract_strided_slice %52 {offsets = [0, 64], sizes = [16, 32], strides = [1, 1]} : vector<16x96xf32> to vector<16x32xf32>
    %60 = arith.truncf %59 : vector<16x32xf32> to vector<16x32xbf16>
    %61 = vector.extract_strided_slice %56 {offsets = [0, 0], sizes = [16, 16], strides = [1, 1]} : vector<16x32xbf16> to vector<16x16xbf16>
    %62 = vector.shape_cast %61 : vector<16x16xbf16> to vector<2x8x16xbf16>
    %63 = vector.extract_strided_slice %58 {offsets = [0, 0], sizes = [16, 16], strides = [1, 1]} : vector<16x32xbf16> to vector<16x16xbf16>
    %64 = vector.shape_cast %63 : vector<16x16xbf16> to vector<2x8x16xbf16>
    %65 = vector.extract_strided_slice %60 {offsets = [0, 0], sizes = [16, 16], strides = [1, 1]} : vector<16x32xbf16> to vector<16x16xbf16>
    %66 = vector.shape_cast %65 : vector<16x16xbf16> to vector<2x8x16xbf16>
    "tpu.trace_start"() <{level = 10 : i32, message = "bqd,bkd->bqk"}> : () -> ()
    %cst_28 = arith.constant dense<0.000000e+00> : vector<2x8x8xf32>
    %67 = tpu.matmul %62, %64, %cst_28 {dimension_numbers = #tpu.dot_dimension_numbers<[2], [2], [1], [1], [0, 0, 0, 1, 1, 1], [0], [0]>} : vector<2x8x16xbf16>, vector<2x8x16xbf16>, vector<2x8x8xf32> -> vector<2x8x8xf32>
    "tpu.trace_stop"() : () -> ()
    %68 = vector.broadcast %11 : vector<1x8x8xf32> to vector<2x8x8xf32>
    %69 = arith.addf %67, %68 : vector<2x8x8xf32>
    %70 = vector.broadcast %17 : vector<2x1x8xf32> to vector<2x8x8xf32>
    %71 = arith.addf %69, %70 : vector<2x8x8xf32>
    %cst_29 = arith.constant dense<0xFF800000> : vector<2x8xf32>
    %72 = vector.multi_reduction <maximumf>, %71, %cst_29 [2] : vector<2x8x8xf32> to vector<2x8xf32>
    %73 = vector.shape_cast %72 : vector<2x8xf32> to vector<2x8x1xf32>
    %74 = vector.broadcast %73 : vector<2x8x1xf32> to vector<2x8x8xf32>
    %75 = arith.subf %71, %74 : vector<2x8x8xf32>
    %76 = math.exp %75 : vector<2x8x8xf32>
    %cst_30 = arith.constant dense<0.000000e+00> : vector<2x8xf32>
    %77 = vector.multi_reduction <add>, %76, %cst_30 [2] : vector<2x8x8xf32> to vector<2x8xf32>
    %78 = vector.shape_cast %77 : vector<2x8xf32> to vector<2x8x1xf32>
    %79 = tpu.reciprocal %78 {approx = true} : vector<2x8x1xf32> -> vector<2x8x1xf32>
    %80 = vector.broadcast %79 : vector<2x8x1xf32> to vector<2x8x8xf32>
    %81 = arith.mulf %76, %80 : vector<2x8x8xf32>
    %82 = arith.truncf %81 : vector<2x8x8xf32> to vector<2x8x8xbf16>
    "tpu.trace_start"() <{level = 10 : i32, message = "bqk,bkd->bqd"}> : () -> ()
    %cst_31 = arith.constant dense<0.000000e+00> : vector<2x8x16xf32>
    %83 = tpu.matmul %82, %66, %cst_31 {dimension_numbers = #tpu.dot_dimension_numbers<[2], [1], [1], [2], [0, 0, 0, 1, 1, 2], [0], [0]>} : vector<2x8x8xbf16>, vector<2x8x16xbf16>, vector<2x8x16xf32> -> vector<2x8x16xf32>
    "tpu.trace_stop"() : () -> ()
    %84 = vector.shape_cast %83 : vector<2x8x16xf32> to vector<16x16xf32>
    %85 = vector.extract_strided_slice %56 {offsets = [0, 16], sizes = [16, 16], strides = [1, 1]} : vector<16x32xbf16> to vector<16x16xbf16>
    %86 = vector.shape_cast %85 : vector<16x16xbf16> to vector<2x8x16xbf16>
    %87 = vector.extract_strided_slice %58 {offsets = [0, 16], sizes = [16, 16], strides = [1, 1]} : vector<16x32xbf16> to vector<16x16xbf16>
    %88 = vector.shape_cast %87 : vector<16x16xbf16> to vector<2x8x16xbf16>
    %89 = vector.extract_strided_slice %60 {offsets = [0, 16], sizes = [16, 16], strides = [1, 1]} : vector<16x32xbf16> to vector<16x16xbf16>
    %90 = vector.shape_cast %89 : vector<16x16xbf16> to vector<2x8x16xbf16>
    "tpu.trace_start"() <{level = 10 : i32, message = "bqd,bkd->bqk"}> : () -> ()
    %cst_32 = arith.constant dense<0.000000e+00> : vector<2x8x8xf32>
    %91 = tpu.matmul %86, %88, %cst_32 {dimension_numbers = #tpu.dot_dimension_numbers<[2], [2], [1], [1], [0, 0, 0, 1, 1, 1], [0], [0]>} : vector<2x8x16xbf16>, vector<2x8x16xbf16>, vector<2x8x8xf32> -> vector<2x8x8xf32>
    "tpu.trace_stop"() : () -> ()
    %92 = vector.broadcast %11 : vector<1x8x8xf32> to vector<2x8x8xf32>
    %93 = arith.addf %91, %92 : vector<2x8x8xf32>
    %94 = vector.broadcast %17 : vector<2x1x8xf32> to vector<2x8x8xf32>
    %95 = arith.addf %93, %94 : vector<2x8x8xf32>
    %cst_33 = arith.constant dense<0xFF800000> : vector<2x8xf32>
    %96 = vector.multi_reduction <maximumf>, %95, %cst_33 [2] : vector<2x8x8xf32> to vector<2x8xf32>
    %97 = vector.shape_cast %96 : vector<2x8xf32> to vector<2x8x1xf32>
    %98 = vector.broadcast %97 : vector<2x8x1xf32> to vector<2x8x8xf32>
    %99 = arith.subf %95, %98 : vector<2x8x8xf32>
    %100 = math.exp %99 : vector<2x8x8xf32>
    %cst_34 = arith.constant dense<0.000000e+00> : vector<2x8xf32>
    %101 = vector.multi_reduction <add>, %100, %cst_34 [2] : vector<2x8x8xf32> to vector<2x8xf32>
    %102 = vector.shape_cast %101 : vector<2x8xf32> to vector<2x8x1xf32>
    %103 = tpu.reciprocal %102 {approx = true} : vector<2x8x1xf32> -> vector<2x8x1xf32>
    %104 = vector.broadcast %103 : vector<2x8x1xf32> to vector<2x8x8xf32>
    %105 = arith.mulf %100, %104 : vector<2x8x8xf32>
    %106 = arith.truncf %105 : vector<2x8x8xf32> to vector<2x8x8xbf16>
    "tpu.trace_start"() <{level = 10 : i32, message = "bqk,bkd->bqd"}> : () -> ()
    %cst_35 = arith.constant dense<0.000000e+00> : vector<2x8x16xf32>
    %107 = tpu.matmul %106, %90, %cst_35 {dimension_numbers = #tpu.dot_dimension_numbers<[2], [1], [1], [2], [0, 0, 0, 1, 1, 2], [0], [0]>} : vector<2x8x8xbf16>, vector<2x8x16xbf16>, vector<2x8x16xf32> -> vector<2x8x16xf32>
    "tpu.trace_stop"() : () -> ()
    %108 = vector.shape_cast %107 : vector<2x8x16xf32> to vector<16x16xf32>
    %109 = tpu.concatenate %84, %108 in 1 : vector<16x16xf32>, vector<16x16xf32> -> vector<16x32xf32>
    %110 = arith.truncf %109 : vector<16x32xf32> to vector<16x32xbf16>
    %c0_36 = arith.constant 0 : index
    %c0_37 = arith.constant 0 : index
    %c0_38 = arith.constant 0 : index
    %111 = vector.load %arg8[%c0_36, %c0_37, %c0_38] : memref<1x32x32xbf16, #tpu.memory_space<vmem>>, vector<1x32x32xbf16>
    %112 = vector.shape_cast %111 : vector<1x32x32xbf16> to vector<32x32xbf16>
    %cst_39 = arith.constant dense<0.000000e+00> : vector<16x32xf32>
    %113 = tpu.matmul %110, %112, %cst_39 {dimension_numbers = #tpu.dot_dimension_numbers<[1], [0], [0], [1], [0, 0, 1, 1], [], []>} : vector<16x32xbf16>, vector<32x32xbf16>, vector<16x32xf32> -> vector<16x32xf32>
    %114 = arith.addf %18, %113 : vector<16x32xf32>
    %c0_40 = arith.constant 0 : index
    %c0_41 = arith.constant 0 : index
    %c0_42 = arith.constant 0 : index
    %115 = vector.load %arg9[%c0_40, %c0_41, %c0_42] : memref<1x1x32xf32, #tpu.memory_space<vmem>>, vector<1x1x32xf32>
    %116 = vector.shape_cast %115 : vector<1x1x32xf32> to vector<1x32xf32>
    %117 = vector.broadcast %116 : vector<1x32xf32> to vector<16x32xf32>
    %118 = arith.addf %114, %117 : vector<16x32xf32>
    %c0_43 = arith.constant 0 : index
    %c0_44 = arith.constant 0 : index
    %c0_45 = arith.constant 0 : index
    %119 = vector.load %arg10[%c0_43, %c0_44, %c0_45] : memref<1x1x32xf32, #tpu.memory_space<vmem>>, vector<1x1x32xf32>
    %120 = vector.shape_cast %119 : vector<1x1x32xf32> to vector<1x32xf32>
    %c0_46 = arith.constant 0 : index
    %c0_47 = arith.constant 0 : index
    %c0_48 = arith.constant 0 : index
    %121 = vector.load %arg11[%c0_46, %c0_47, %c0_48] : memref<1x1x32xf32, #tpu.memory_space<vmem>>, vector<1x1x32xf32>
    %122 = vector.shape_cast %121 : vector<1x1x32xf32> to vector<1x32xf32>
    %cst_49 = arith.constant dense<0.000000e+00> : vector<16xf32>
    %123 = vector.multi_reduction <add>, %118, %cst_49 [1] : vector<16x32xf32> to vector<16xf32>
    %124 = vector.shape_cast %123 : vector<16xf32> to vector<16x1xf32>
    %cst_50 = arith.constant 3.200000e+01 : f32
    %125 = vector.broadcast %cst_50 : f32 to vector<16x1xf32>
    %126 = arith.divf %124, %125 : vector<16x1xf32>
    %127 = vector.broadcast %126 : vector<16x1xf32> to vector<16x32xf32>
    %128 = arith.subf %118, %127 : vector<16x32xf32>
    %129 = arith.mulf %128, %128 : vector<16x32xf32>
    %cst_51 = arith.constant dense<0.000000e+00> : vector<16xf32>
    %130 = vector.multi_reduction <add>, %129, %cst_51 [1] : vector<16x32xf32> to vector<16xf32>
    %131 = vector.shape_cast %130 : vector<16xf32> to vector<16x1xf32>
    %cst_52 = arith.constant 3.200000e+01 : f32
    %132 = vector.broadcast %cst_52 : f32 to vector<16x1xf32>
    %133 = arith.divf %131, %132 : vector<16x1xf32>
    %134 = vector.broadcast %126 : vector<16x1xf32> to vector<16x32xf32>
    %135 = arith.subf %118, %134 : vector<16x32xf32>
    %cst_53 = arith.constant 9.99999974E-6 : f32
    %136 = vector.broadcast %cst_53 : f32 to vector<16x1xf32>
    %137 = arith.addf %133, %136 : vector<16x1xf32>
    %138 = math.rsqrt %137 : vector<16x1xf32>
    %139 = vector.broadcast %138 : vector<16x1xf32> to vector<16x32xf32>
    %140 = arith.mulf %135, %139 : vector<16x32xf32>
    %141 = vector.broadcast %120 : vector<1x32xf32> to vector<16x32xf32>
    %142 = arith.mulf %140, %141 : vector<16x32xf32>
    %143 = vector.broadcast %122 : vector<1x32xf32> to vector<16x32xf32>
    %144 = arith.addf %142, %143 : vector<16x32xf32>
    %145 = arith.truncf %144 : vector<16x32xf32> to vector<16x32xbf16>
    %c0_54 = arith.constant 0 : index
    %c0_55 = arith.constant 0 : index
    %c0_56 = arith.constant 0 : index
    %146 = vector.load %arg12[%c0_54, %c0_55, %c0_56] : memref<1x32x128xbf16, #tpu.memory_space<vmem>>, vector<1x32x128xbf16>
    %147 = vector.shape_cast %146 : vector<1x32x128xbf16> to vector<32x128xbf16>
    %cst_57 = arith.constant dense<0.000000e+00> : vector<16x128xf32>
    %148 = tpu.matmul %145, %147, %cst_57 {dimension_numbers = #tpu.dot_dimension_numbers<[1], [0], [0], [1], [0, 0, 1, 1], [], []>} : vector<16x32xbf16>, vector<32x128xbf16>, vector<16x128xf32> -> vector<16x128xf32>
    %c0_58 = arith.constant 0 : index
    %c0_59 = arith.constant 0 : index
    %c0_60 = arith.constant 0 : index
    %149 = vector.load %arg13[%c0_58, %c0_59, %c0_60] : memref<1x1x128xf32, #tpu.memory_space<vmem>>, vector<1x1x128xf32>
    %150 = vector.shape_cast %149 : vector<1x1x128xf32> to vector<1x128xf32>
    %151 = vector.broadcast %150 : vector<1x128xf32> to vector<16x128xf32>
    %152 = arith.addf %148, %151 : vector<16x128xf32>
    %cst_61 = arith.constant 5.000000e-01 : f32
    %153 = vector.broadcast %cst_61 : f32 to vector<16x128xf32>
    %154 = arith.mulf %153, %152 : vector<16x128xf32>
    %cst_62 = arith.constant 4.471500e-02 : f32
    %155 = vector.broadcast %cst_62 : f32 to vector<16x128xf32>
    %156 = arith.mulf %155, %152 : vector<16x128xf32>
    %157 = arith.mulf %156, %152 : vector<16x128xf32>
    %158 = arith.mulf %157, %152 : vector<16x128xf32>
    %159 = arith.addf %152, %158 : vector<16x128xf32>
    %cst_63 = arith.constant 0.797884583 : f32
    %160 = vector.broadcast %cst_63 : f32 to vector<16x128xf32>
    %161 = arith.mulf %160, %159 : vector<16x128xf32>
    %162 = math.tanh %161 : vector<16x128xf32>
    %cst_64 = arith.constant 1.000000e+00 : f32
    %163 = vector.broadcast %cst_64 : f32 to vector<16x128xf32>
    %164 = arith.addf %163, %162 : vector<16x128xf32>
    %165 = arith.mulf %154, %164 : vector<16x128xf32>
    %166 = arith.truncf %165 : vector<16x128xf32> to vector<16x128xbf16>
    %c0_65 = arith.constant 0 : index
    %c0_66 = arith.constant 0 : index
    %c0_67 = arith.constant 0 : index
    %167 = vector.load %arg14[%c0_65, %c0_66, %c0_67] : memref<1x128x32xbf16, #tpu.memory_space<vmem>>, vector<1x128x32xbf16>
    %168 = vector.shape_cast %167 : vector<1x128x32xbf16> to vector<128x32xbf16>
    %cst_68 = arith.constant dense<0.000000e+00> : vector<16x32xf32>
    %169 = tpu.matmul %166, %168, %cst_68 {dimension_numbers = #tpu.dot_dimension_numbers<[1], [0], [0], [1], [0, 0, 1, 1], [], []>} : vector<16x128xbf16>, vector<128x32xbf16>, vector<16x32xf32> -> vector<16x32xf32>
    %170 = arith.addf %118, %169 : vector<16x32xf32>
    %c0_69 = arith.constant 0 : index
    %c0_70 = arith.constant 0 : index
    %c0_71 = arith.constant 0 : index
    %171 = vector.load %arg15[%c0_69, %c0_70, %c0_71] : memref<1x1x32xf32, #tpu.memory_space<vmem>>, vector<1x1x32xf32>
    %172 = vector.shape_cast %171 : vector<1x1x32xf32> to vector<1x32xf32>
    %173 = vector.broadcast %172 : vector<1x32xf32> to vector<16x32xf32>
    %174 = arith.addf %170, %173 : vector<16x32xf32>
    %c0_72 = arith.constant 0 : index
    %c0_73 = arith.constant 0 : index
    %175 = vector.load %arg23[%c0_72, %c0_73] : memref<16x32xf32, #tpu.memory_space<vmem>>, vector<16x32xf32>
    tpu.vector_store %arg23[%c0_72, %c0_73], %174 {strides = array<i32>} : memref<16x32xf32, #tpu.memory_space<vmem>>, vector<16x32xf32>,
    %c1_i32 = arith.constant 1 : i32
    %176 = arith.cmpi eq, %arg1, %c1_i32 : i32
    %177 = arith.extui %176 : i1 to i32
    %c0_i32_74 = arith.constant 0 : i32
    %178 = arith.cmpi ne, %177, %c0_i32_74 : i32
    scf.if %178 {
      %c0_75 = arith.constant 0 : index
      %c0_76 = arith.constant 0 : index
      %179 = vector.load %arg16[%c0_75, %c0_76] : memref<1x32xf32, #tpu.memory_space<vmem>>, vector<1x32xf32>
      %c0_77 = arith.constant 0 : index
      %c0_78 = arith.constant 0 : index
      %180 = vector.load %arg17[%c0_77, %c0_78] : memref<1x32xf32, #tpu.memory_space<vmem>>, vector<1x32xf32>
      %cst_79 = arith.constant dense<0.000000e+00> : vector<16xf32>
      %181 = vector.multi_reduction <add>, %174, %cst_79 [1] : vector<16x32xf32> to vector<16xf32>
      %182 = vector.shape_cast %181 : vector<16xf32> to vector<16x1xf32>
      %cst_80 = arith.constant 3.200000e+01 : f32
      %183 = vector.broadcast %cst_80 : f32 to vector<16x1xf32>
      %184 = arith.divf %182, %183 : vector<16x1xf32>
      %185 = vector.broadcast %184 : vector<16x1xf32> to vector<16x32xf32>
      %186 = arith.subf %174, %185 : vector<16x32xf32>
      %187 = arith.mulf %186, %186 : vector<16x32xf32>
      %cst_81 = arith.constant dense<0.000000e+00> : vector<16xf32>
      %188 = vector.multi_reduction <add>, %187, %cst_81 [1] : vector<16x32xf32> to vector<16xf32>
      %189 = vector.shape_cast %188 : vector<16xf32> to vector<16x1xf32>
      %cst_82 = arith.constant 3.200000e+01 : f32
      %190 = vector.broadcast %cst_82 : f32 to vector<16x1xf32>
      %191 = arith.divf %189, %190 : vector<16x1xf32>
      %192 = vector.broadcast %184 : vector<16x1xf32> to vector<16x32xf32>
      %193 = arith.subf %174, %192 : vector<16x32xf32>
      %cst_83 = arith.constant 9.99999974E-6 : f32
      %194 = vector.broadcast %cst_83 : f32 to vector<16x1xf32>
      %195 = arith.addf %191, %194 : vector<16x1xf32>
      %196 = math.rsqrt %195 : vector<16x1xf32>
      %197 = vector.broadcast %196 : vector<16x1xf32> to vector<16x32xf32>
      %198 = arith.mulf %193, %197 : vector<16x32xf32>
      %199 = vector.broadcast %179 : vector<1x32xf32> to vector<16x32xf32>
      %200 = arith.mulf %198, %199 : vector<16x32xf32>
      %201 = vector.broadcast %180 : vector<1x32xf32> to vector<16x32xf32>
      %202 = arith.addf %200, %201 : vector<16x32xf32>
      %203 = vector.shape_cast %202 : vector<16x32xf32> to vector<2x8x32xf32>
      %cst_84 = arith.constant dense<0.000000e+00> : vector<2xf32>
      %204 = vector.multi_reduction <add>, %4, %cst_84 [1] : vector<2x8xf32> to vector<2xf32>
      %205 = vector.shape_cast %204 : vector<2xf32> to vector<2x1xf32>
      %cst_85 = arith.constant 1.000000e+00 : f32
      %206 = vector.broadcast %cst_85 : f32 to vector<2x1xf32>
      %207 = arith.maximumf %205, %206 : vector<2x1xf32>
      %208 = vector.shape_cast %4 : vector<2x8xf32> to vector<2x8x1xf32>
      %209 = vector.broadcast %208 : vector<2x8x1xf32> to vector<2x8x32xf32>
      %210 = arith.mulf %203, %209 : vector<2x8x32xf32>
      %cst_86 = arith.constant dense<0.000000e+00> : vector<2x32xf32>
      %211 = vector.multi_reduction <add>, %210, %cst_86 [1] : vector<2x8x32xf32> to vector<2x32xf32>
      %212 = vector.broadcast %207 : vector<2x1xf32> to vector<2x32xf32>
      %213 = arith.divf %211, %212 : vector<2x32xf32>
      %214 = vector.extract_strided_slice %213 {offsets = [0, 0], sizes = [1, 32], strides = [1, 1]} : vector<2x32xf32> to vector<1x32xf32>
      %215 = arith.truncf %214 : vector<1x32xf32> to vector<1x32xbf16>
      %216 = vector.extract_strided_slice %213 {offsets = [1, 0], sizes = [1, 32], strides = [1, 1]} : vector<2x32xf32> to vector<1x32xf32>
      %217 = arith.truncf %216 : vector<1x32xf32> to vector<1x32xbf16>
      %c0_87 = arith.constant 0 : index
      %c0_88 = arith.constant 0 : index
      %218 = vector.load %arg18[%c0_87, %c0_88] : memref<64x16xbf16, #tpu.memory_space<vmem>>, vector<64x16xbf16>
      %219 = vector.extract_strided_slice %218 {offsets = [0, 0], sizes = [32, 16], strides = [1, 1]} : vector<64x16xbf16> to vector<32x16xbf16>
      %cst_89 = arith.constant dense<0.000000e+00> : vector<1x16xf32>
      %220 = tpu.matmul %215, %219, %cst_89 {dimension_numbers = #tpu.dot_dimension_numbers<[1], [0], [0], [1], [0, 0, 1, 1], [], []>} : vector<1x32xbf16>, vector<32x16xbf16>, vector<1x16xf32> -> vector<1x16xf32>
      %221 = vector.extract_strided_slice %218 {offsets = [32, 0], sizes = [32, 16], strides = [1, 1]} : vector<64x16xbf16> to vector<32x16xbf16>
      %cst_90 = arith.constant dense<0.000000e+00> : vector<1x16xf32>
      %222 = tpu.matmul %217, %221, %cst_90 {dimension_numbers = #tpu.dot_dimension_numbers<[1], [0], [0], [1], [0, 0, 1, 1], [], []>} : vector<1x32xbf16>, vector<32x16xbf16>, vector<1x16xf32> -> vector<1x16xf32>
      %223 = arith.addf %220, %222 : vector<1x16xf32>
      %c0_91 = arith.constant 0 : index
      %c0_92 = arith.constant 0 : index
      %224 = vector.load %arg19[%c0_91, %c0_92] : memref<1x16xf32, #tpu.memory_space<vmem>>, vector<1x16xf32>
      %225 = arith.addf %223, %224 : vector<1x16xf32>
      %cst_93 = arith.constant 0.000000e+00 : f32
      %226 = vector.broadcast %cst_93 : f32 to vector<1x16xf32>
      %227 = arith.maximumf %225, %226 : vector<1x16xf32>
      %228 = arith.truncf %227 : vector<1x16xf32> to vector<1x16xbf16>
      %c0_94 = arith.constant 0 : index
      %c0_95 = arith.constant 0 : index
      %229 = vector.load %arg20[%c0_94, %c0_95] : memref<16x128xbf16, #tpu.memory_space<vmem>>, vector<16x128xbf16>
      %cst_96 = arith.constant dense<0.000000e+00> : vector<1x128xf32>
      %230 = tpu.matmul %228, %229, %cst_96 {dimension_numbers = #tpu.dot_dimension_numbers<[1], [0], [0], [1], [0, 0, 1, 1], [], []>} : vector<1x16xbf16>, vector<16x128xbf16>, vector<1x128xf32> -> vector<1x128xf32>
      %c0_97 = arith.constant 0 : index
      %c0_98 = arith.constant 0 : index
      %231 = vector.load %arg21[%c0_97, %c0_98] : memref<1x128xf32, #tpu.memory_space<vmem>>, vector<1x128xf32>
      %232 = arith.addf %230, %231 : vector<1x128xf32>
      %c0_99 = arith.constant 0 : index
      %c0_100 = arith.constant 0 : index
      %c0_101 = arith.constant 0 : index
      %233 = vector.load %arg22[%c0_99, %c0_100, %c0_101] : memref<1x1x128xf32, #tpu.memory_space<vmem>>, vector<1x1x128xf32>
      %234 = vector.shape_cast %233 : vector<1x1x128xf32> to vector<1x128xf32>
      %235 = vector.shape_cast %232 : vector<1x128xf32> to vector<1x1x128xf32>
      tpu.vector_store %arg22[%c0_99, %c0_100, %c0_101], %235 {strides = array<i32>} : memref<1x1x128xf32, #tpu.memory_space<vmem>>, vector<1x1x128xf32>,
    } else {
    }
    return
  }
  func.func @transform_0(%arg0: i32, %arg1: i32) -> (i32, i32, i32) {
    %c0_i32 = arith.constant 0 : i32
    %c0_i32_0 = arith.constant 0 : i32
    %c0_i32_1 = arith.constant 0 : i32
    return %arg0, %c0_i32, %c0_i32_0 : i32, i32, i32
  }
  func.func @transform_1(%arg0: i32, %arg1: i32) -> (i32, i32, i32) {
    %c0_i32 = arith.constant 0 : i32
    %c0_i32_0 = arith.constant 0 : i32
    %c0_i32_1 = arith.constant 0 : i32
    return %arg0, %c0_i32, %c0_i32_0 : i32, i32, i32
  }
  func.func @transform_2(%arg0: i32, %arg1: i32) -> (i32, i32, i32) {
    %c0_i32 = arith.constant 0 : i32
    %c0_i32_0 = arith.constant 0 : i32
    %c0_i32_1 = arith.constant 0 : i32
    return %arg1, %c0_i32, %c0_i32_0 : i32, i32, i32
  }
  func.func @transform_3(%arg0: i32, %arg1: i32) -> (i32, i32, i32) {
    %c0_i32 = arith.constant 0 : i32
    %c0_i32_0 = arith.constant 0 : i32
    %c0_i32_1 = arith.constant 0 : i32
    return %arg1, %c0_i32, %c0_i32_0 : i32, i32, i32
  }
  func.func @transform_4(%arg0: i32, %arg1: i32) -> (i32, i32, i32) {
    %c0_i32 = arith.constant 0 : i32
    %c0_i32_0 = arith.constant 0 : i32
    %c0_i32_1 = arith.constant 0 : i32
    return %arg1, %c0_i32, %c0_i32_0 : i32, i32, i32
  }
  func.func @transform_5(%arg0: i32, %arg1: i32) -> (i32, i32, i32) {
    %c0_i32 = arith.constant 0 : i32
    %c0_i32_0 = arith.constant 0 : i32
    %c0_i32_1 = arith.constant 0 : i32
    return %arg1, %c0_i32, %c0_i32_0 : i32, i32, i32
  }
  func.func @transform_6(%arg0: i32, %arg1: i32) -> (i32, i32, i32) {
    %c0_i32 = arith.constant 0 : i32
    %c0_i32_0 = arith.constant 0 : i32
    %c0_i32_1 = arith.constant 0 : i32
    return %arg1, %c0_i32, %c0_i32_0 : i32, i32, i32
  }
  func.func @transform_7(%arg0: i32, %arg1: i32) -> (i32, i32, i32) {
    %c0_i32 = arith.constant 0 : i32
    %c0_i32_0 = arith.constant 0 : i32
    %c0_i32_1 = arith.constant 0 : i32
    return %arg1, %c0_i32, %c0_i32_0 : i32, i32, i32
  }
  func.func @transform_8(%arg0: i32, %arg1: i32) -> (i32, i32, i32) {
    %c0_i32 = arith.constant 0 : i32
    %c0_i32_0 = arith.constant 0 : i32
    %c0_i32_1 = arith.constant 0 : i32
    return %arg1, %c0_i32, %c0_i32_0 : i32, i32, i32
  }
  func.func @transform_9(%arg0: i32, %arg1: i32) -> (i32, i32, i32) {
    %c0_i32 = arith.constant 0 : i32
    %c0_i32_0 = arith.constant 0 : i32
    %c0_i32_1 = arith.constant 0 : i32
    return %arg1, %c0_i32, %c0_i32_0 : i32, i32, i32
  }
  func.func @transform_10(%arg0: i32, %arg1: i32) -> (i32, i32, i32) {
    %c0_i32 = arith.constant 0 : i32
    %c0_i32_0 = arith.constant 0 : i32
    %c0_i32_1 = arith.constant 0 : i32
    return %arg1, %c0_i32, %c0_i32_0 : i32, i32, i32
  }
  func.func @transform_11(%arg0: i32, %arg1: i32) -> (i32, i32, i32) {
    %c0_i32 = arith.constant 0 : i32
    %c0_i32_0 = arith.constant 0 : i32
    %c0_i32_1 = arith.constant 0 : i32
    return %arg1, %c0_i32, %c0_i32_0 : i32, i32, i32
  }
  func.func @transform_12(%arg0: i32, %arg1: i32) -> (i32, i32, i32) {
    %c0_i32 = arith.constant 0 : i32
    %c0_i32_0 = arith.constant 0 : i32
    %c0_i32_1 = arith.constant 0 : i32
    return %arg1, %c0_i32, %c0_i32_0 : i32, i32, i32
  }
  func.func @transform_13(%arg0: i32, %arg1: i32) -> (i32, i32, i32) {
    %c0_i32 = arith.constant 0 : i32
    %c0_i32_0 = arith.constant 0 : i32
    %c0_i32_1 = arith.constant 0 : i32
    return %arg1, %c0_i32, %c0_i32_0 : i32, i32, i32
  }
  func.func @transform_14(%arg0: i32, %arg1: i32) -> (i32, i32) {
    %c0_i32 = arith.constant 0 : i32
    %c0_i32_0 = arith.constant 0 : i32
    %c0_i32_1 = arith.constant 0 : i32
    return %c0_i32, %c0_i32_0 : i32, i32
  }
  func.func @transform_15(%arg0: i32, %arg1: i32) -> (i32, i32) {
    %c0_i32 = arith.constant 0 : i32
    %c0_i32_0 = arith.constant 0 : i32
    %c0_i32_1 = arith.constant 0 : i32
    return %c0_i32, %c0_i32_0 : i32, i32
  }
  func.func @transform_16(%arg0: i32, %arg1: i32) -> (i32, i32) {
    %c0_i32 = arith.constant 0 : i32
    %c0_i32_0 = arith.constant 0 : i32
    %c0_i32_1 = arith.constant 0 : i32
    return %c0_i32, %c0_i32_0 : i32, i32
  }
  func.func @transform_17(%arg0: i32, %arg1: i32) -> (i32, i32) {
    %c0_i32 = arith.constant 0 : i32
    %c0_i32_0 = arith.constant 0 : i32
    %c0_i32_1 = arith.constant 0 : i32
    return %c0_i32, %c0_i32_0 : i32, i32
  }
  func.func @transform_18(%arg0: i32, %arg1: i32) -> (i32, i32) {
    %c0_i32 = arith.constant 0 : i32
    %c0_i32_0 = arith.constant 0 : i32
    %c0_i32_1 = arith.constant 0 : i32
    return %c0_i32, %c0_i32_0 : i32, i32
  }
  func.func @transform_19(%arg0: i32, %arg1: i32) -> (i32, i32) {
    %c0_i32 = arith.constant 0 : i32
    %c0_i32_0 = arith.constant 0 : i32
    %c0_i32_1 = arith.constant 0 : i32
    return %c0_i32, %c0_i32_0 : i32, i32
  }
  func.func @transform_20(%arg0: i32, %arg1: i32) -> (i32, i32, i32) {
    %c0_i32 = arith.constant 0 : i32
    %c0_i32_0 = arith.constant 0 : i32
    %c0_i32_1 = arith.constant 0 : i32
    return %arg0, %c0_i32, %c0_i32_0 : i32, i32, i32
  }
}

</mosaic_0001>

<bundles_post_ra>
// kernel: forward.1
= control target key start
LH: loop header
LB: loop body
LE: loop exit
PB: predicated region body
PF: predicated region fallthrough
CT: control target
= control target key end

     0   :  { %s3338_s0 = inlined_call_operand.vmem [shape: f32[4,8,32], index: 0, kind: input, shape index: {}]   ;;  %s3339_s1 = inlined_call_operand.vmem [shape: f32[2,2,8], index: 1, kind: input, shape index: {}]   ;;  %s3340_s2 = inlined_call_operand.vmem [shape: f32[2,1,32], index: 2, kind: input, shape index: {}]   ;;  %s3341_s3 = inlined_call_operand.vmem [shape: f32[2,1,32], index: 3, kind: input, shape index: {}]   ;;  %s3342_s4 = inlined_call_operand.vmem [shape: bf16[2,32,96], index: 4, kind: input, shape index: {}]   ;;  %s3343_s5 = inlined_call_operand.vmem [shape: f32[2,1,96], index: 5, kind: input, shape index: {}]   ;;  %s3344_s6 = inlined_call_operand.vmem [shape: bf16[2,32,32], index: 6, kind: input, shape index: {}]   ;;  %s3345_s7 = inlined_call_operand.vmem [shape: f32[2,1,32], index: 7, kind: input, shape index: {}]   ;;  %s3346_s8 = inlined_call_operand.vmem [shape: f32[2,1,32], index: 8, kind: input, shape index: {}]   ;;  %s3347_s9 = inlined_call_operand.vmem [shape: f32[2,1,32], index: 9, kind: input, shape index: {}]   ;;  %s3348_s10 = inlined_call_operand.vmem [shape: bf16[2,32,128], index: 10, kind: input, shape index: {}]   ;;  %s3349_s11 = inlined_call_operand.vmem [shape: f32[2,1,128], index: 11, kind: input, shape index: {}]   ;;  %s3350_s12 = inlined_call_operand.vmem [shape: bf16[2,128,32], index: 12, kind: input, shape index: {}]   ;;  %s3351_s13 = inlined_call_operand.vmem [shape: f32[2,1,32], index: 13, kind: input, shape index: {}]   ;;  %s3352_s14 = inlined_call_operand.vmem [shape: f32[1,32], index: 14, kind: input, shape index: {}]   ;;  %s3353_s15 = inlined_call_operand.vmem [shape: f32[1,32], index: 15, kind: input, shape index: {}]   ;;  %s3354_s16 = inlined_call_operand.vmem [shape: bf16[64,16], index: 16, kind: input, shape index: {}]   ;;  %s3355_s17 = inlined_call_operand.vmem [shape: f32[1,16], index: 17, kind: input, shape index: {}]   ;;  %s3356_s18 = inlined_call_operand.vmem [shape: bf16[16,128], index: 18, kind: input, shape index: {}]   ;;  %s3357_s19 = inlined_call_operand.vmem [shape: f32[1,128], index: 19, kind: input, shape index: {}]   ;;  %s3358_s20 = inlined_call_operand.hbm [shape: f32[2,1,128], index: 20, kind: output, shape index: {}]  }
   0x1   :  { %3373 = sst [smem:[#allocation18_spill]] %s3338_s0 }
   0x2   :  { %3374 = sst [smem:[#allocation19_spill]] %s3339_s1 }
   0x3   :  { %3375 = sst [smem:[#allocation20_spill]] %s3340_s2 }
   0x4   :  { %3376 = sst [smem:[#allocation21_spill]] %s3341_s3 }
   0x5   :  { %3377 = sst [smem:[#allocation22_spill]] %s3342_s4 }
   0x6   :  { %3378 = sst [smem:[#allocation23_spill]] %s3344_s6 }
   0x7   :  { %3379 = sst [smem:[#allocation24_spill]] %s3352_s14 }
   0x8   :  { %3380 = sst [smem:[#allocation25_spill]] %s3353_s15 }
   0x9   :  { %3381 = sst [smem:[#allocation26_spill]] %s3354_s16 }
   0xa   :  { %3382 = sst [smem:[#allocation27_spill]] %s3355_s17 }
   0xb   :  { %3383 = sst [smem:[#allocation28_spill]] %s3356_s18 }
   0xc   :  { %3384 = sst [smem:[#allocation29_spill]] %s3357_s19 }
   0xd   :  { %3385 = sst [smem:[#allocation30_spill]] %s3358_s20 }
   0xe   :  { %25 = vsyncpa [#allocation4], 0 }
   0xf   :  { %27 = vsyncpa [#allocation4 + $0x1], 0  ;;  %s2874_s1 = smov 0   ;;  %s2876_s22 = smov 0  }
  0x10   :  { %s2878_s23 = smov 0   ;;  %s2880_s24 = smov 0  }
  0x11   :  { %s2882_s2 = smov 0   ;;  %s2884_s25 = smov 0  }
  0x12   :  { %s2886_s3 = smov 0   ;;  %s2888_s26 = smov 0  }
  0x13 LB: > { %3386 = sst [smem:[#allocation6_spill]] %s2726_s1  ;;  %s2285_s27 = sadd.s32 4294967295, %s2754_s26   ;;  %s2754_s26 = sphi %s2888_s26, %s33_s26   ;;  %s2750_s3 = sphi %s2886_s3, %s3433_s3   ;;  %s2746_s25 = sphi %s2884_s25, %s3432_s25   ;;  %s2742_s2 = sphi %s2882_s2, %s3431_s2   ;;  %s2738_s24 = sphi %s2880_s24, %s3430_s24   ;;  %s2734_s23 = sphi %s2878_s23, %s3429_s23   ;;  %s2730_s22 = sphi %s2876_s22, %s3435_s22   ;;  %s2726_s1 = sphi %s2874_s1, %s3434_s1  }
  0x14   : > { %3387 = sst [smem:[#allocation7_spill]] %s2734_s23  ;;  %s2286_s28 = sadd.s32 4294967294, %s2754_s26  }
  0x15   : > { %3388 = sst [smem:[#allocation8_spill]] %s2742_s2  ;;  %s42_s4 = sadd.s32 1, %s2746_s25 }
  0x16   : > { %3389 = sst [smem:[#allocation9_spill]] %s2746_s25  ;;  %p43_p0 = scmp.ge.s32.totalorder %s42_s4, 2 }
  0x17   : > { %3390 = sst [smem:[#allocation10_spill]] %s2750_s3  ;;  %s45_s29 = sadd.s32 1, %s2750_s3 }
  0x18   : > { %3391 = sst [smem:[#allocation11_spill]] %s2754_s26  ;;  %p552_p1 = scmp.ne.s32.totalorder %s2734_s23, %s2730_s22 }
  0x19   : > { %p553_p2 = scmp.eq.s32.totalorder %s2285_s27, 3  ;;  %s3437_s4 = smov (%p43_p0, %s42_s4), 0 }
  0x1a   : > { %3392 = sst [smem:[#allocation12_spill]] %s3437_s4  ;;  %s3439_s29 = smov (!%p43_p0, %s45_s29), %s2750_s3 }
  0x1b   : > { %p2923_p3 = por %p553_p2, %p552_p1  ;;  %p558_p4 = scmp.ne.s32.totalorder %s2730_s22, %s2726_s1 }
  0x1c   : > { %p47_p5 = scmp.ge.s32.totalorder %s3439_s29, 2  ;;  %p559_p6 = scmp.eq.s32.totalorder %s2286_s28, 3 }
  0x1d   : > { %s3393_s30 = scalar_select %p2923_p3, 1, 0 }
  0x1e   : > { %p2289_p7 = scmp.ge.s32.totalorder %s2754_s26, 1  ;;  %p691_p8 = scmp.lt.s32.totalorder %s2754_s26, 5 }
  0x1f   : > { %3394 = sst [smem:[#allocation13_spill]] %s3393_s30  ;;  %s3441_s29 = smov (%p47_p5, %s3439_s29), 0 }
  0x20   : > { %3395 = sst [smem:[#allocation14_spill]] %s3441_s29  ;;  %p2933_p9 = por %p559_p6, %p558_p4 }
  0x21   : > { %p692_p10 = pnand %p2289_p7, %p691_p8  ;;  %s539_s21 = ssub.s32 %s2750_s3, %s3441_s29 }
  0x22   : > { %s3396_s0 = scalar_select %p2933_p9, 1, 0 }
  0x23   : > { %s542_s27 = sadd.s32 1, %s2734_s23  ;;  %p540_p11 = scmp.eq.s32.totalorder %s539_s21, 0 }
  0x24   : > { %3397 = sst [smem:[#allocation15_spill]] %s3396_s0  ;;  %695 = sbr.rel (%p692_p10) target bundleno = 3926 (0xf56), region = 100 }
  0x25   : > { %s2941_s4 = scalar_select %p540_p11, %s2734_s23, %s542_s27  }
  0x27   : > { %3398 = sst [smem:[#allocation16_spill]] %s2941_s4 }
  0x2b   : > { %s2290_s25 = sshll.u32 %s2742_s2, 1  ;;  %p802_p13 = scmp.lt.s32.totalorder %s2742_s2, 1 }
  0x2c   : > { %p797_p12 = scmp.lt.s32.totalorder %s2290_s25, 3  ;;  %p806_p0 = scmp.lt.s32.totalorder %s2738_s24, 1 }
  0x2d   : > { %s803_s0 = scalar_select %p802_p13, %s2742_s2, 1 }
  0x2e   : > { %s3443_s25 = smov (!%p797_p12, %s2290_s25), 3  ;;  %s3399_s21 = sld [smem:[#allocation18_spill]] }
  0x2f   : > { %s2291_s1 = sshll.u32 %s3443_s25, 3  ;;  %s2292_s4 = sshll.u32 %s803_s0, 1 }
  0x30   : > { %s3400_s20 = sld [smem:[#allocation19_spill]]  ;;  %s3404_s6 = sld [smem:[#allocation23_spill]] }
  0x31   : > { %s2957_s19 = scalar_select %p806_p0, %s2738_s24, 1 }
  0x32   : > { %s3406_s29 = sand.u32 1, %s2730_s22   ;;  %p2301_p1 = scmp.ne.s32.totalorder %s2738_s24, 0 }
  0x33   : > { %s2353_s26 = sshll.u32 %s2957_s19, 4  ;;  %s830_s3 = scalar_lea.vmem %s3346_s8, %s2957_s19  ;;  %vm857_vm0 = vcmask (!%p2301_p1), 261120  }
  0x34   : > { %s800_s27 = scalar_lea.vmem %s3399_s21, %s2291_s1  ;;  %s3403_s21 = sld [smem:[#allocation22_spill]] }
  0x35   : > { %s3015_s0 = scalar_lea.vmem [#allocation3], %s3406_s29  ;;  %854 = sbr.rel (%p2301_p1) target bundleno = 60 (0x3c), region = 104  ;;  %v855_v0 = vld [vmem:[%s800_s27] sm:$0xff] (!%p2301_p1)  ;;  %v856_v1 = vld [vmem:[%s800_s27 + $0x8] sm:$0xff] (!%p2301_p1) }
  0x36   : > { %s2954_s30 = scalar_lea.vmem %s3400_s20, %s2292_s4  ;;  %s2980_s16 = scalar_lea.vmem %s3404_s6, %s2353_s26  ;;  %858 = vst.msk [vmem:[#allocation2] sm:$0xff] (!%p2301_p1), %vm857_vm0, %v855_v0  ;;  %859 = vst.msk [vmem:[#allocation2 + $0x8] sm:$0xff] (!%p2301_p1), %vm857_vm0, %v856_v1 }
  0x37   : > { %3405 = sst [smem:[#allocation17_spill]] %s2980_s16  ;;  %s841_s6 = scalar_lea.vmem %s3349_s11, %s2957_s19 }
  0x38   : > { %s2356_s16 = sshll.u32 %s2957_s19, 6  ;;  %s849_s4 = scalar_lea.vmem %s3351_s13, %s2957_s19 }
  0x39   : > { %s3007_s23 = scalar_lea.vmem %s3350_s12, %s2356_s16 }
  0x3a   : > { %s2975_s2 = scalar_lea.vmem %s3403_s21, %s2353_s26  ;;  %s2997_s21 = scalar_lea.vmem %s3348_s10, %s2353_s26 }
  0x3c PF: > { %vm896_vm1 = vcmask 261120   ;;  %v2605_v16 = vld [vmem:[%s2975_s2] sm:$0xff]   ;;  %v2756_v17 = vmov 0.0   ;;  %v2606_v18 = vld [vmem:[%s2975_s2 + $0x8] sm:$0xff]   ;;  %vm2757_vm2 = vmmov 0   ;;  %s3407_s27 = sld [smem:[#allocation20_spill]]  ;;  %s3411_s20 = scalar_lea.vmem %s3343_s5, %s2957_s19  ;;  %v861_v53 = vlaneseq }
  0x3d   : > { %v3018_v2 = vld [vmem:[#allocation2] sm:$0xff]  ;;  %v3020_v3 = vld [vmem:[#allocation2 + $0x8] sm:$0xff]  ;;  %2403 = vmatprep.subr.bf16.mxu0 %v2756_v17  ;;  %2423 = vmatprep.subr.bf16.mxu1 %v2756_v17  ;;  %s3409_s14 = sld [smem:[#allocation21_spill]]  ;;  %s2758_s25 = smov 96   ;;  %vm1023_vm3 = vcmask 130048   ;;  %vm1131_vm6 = vcmask 64512  }
  0x3e   : > { %v897_v4 = vsel %vm896_vm1, %v3018_v2, 0.0  ;;  %v900_v5 = vsel %vm896_vm1, %v3020_v3, 0.0  ;;  %2404 = vmatpush3.bf16.msra.mxu0 %v2605_v16  ;;  %2407 = vmatprep.mubr.msk.bf16.mxu0 %vm2757_vm2, %v2756_v17  ;;  %v2304_v36 = vld [vmem:[%s3411_s20] ss:$0 sm:$0xff]  ;;  %v2759_v54 = vmov 1966171168   ;;  %s3414_s20 = scalar_lea.vmem %s3347_s9, %s2957_s19 }
  0x3f   : > { %898 = vadd.xlane.f32.xlu0 %v897_v4  ;;  %2405 = vmatprep.subr.bf16.mxu0 %v2756_v17  ;;  %v871_v55 = vunpack.c.l.s4 %v2759_v54  ;;  %v3081_v56 = vld [vmem:[%s2954_s30] sm:$0x3]  ;;  %v3083_v57 = vshrl.u32 %v861_v53, 7  ;;  %v2760_v60 = vmov -1e+09   ;;  %v864_v62 = vand.u32 127, %v861_v53 }
  0x40   : > { %2425 = vmatprep.mubr.msk.bf16.mxu1 %vm2757_vm2, %v2756_v17  ;;  %vm867_vm4 = vcmp.gt.f32.partialorder %v3081_v56, 0.5  ;;  %s2761_s30 = smov 64   ;;  %s2762_s29 = smov 80   ;;  %vm1161_vm7 = vcmask 1043456  }
  0x41   : > { %v872_v58 = vunpack.c.0.s8 %v871_v55  ;;  %v868_v61 = vsel %vm867_vm4, 0.0, %v2760_v60  ;;  %vm865_vm5 = vcmp.ge.s32.totalorder %v3083_v57, %v864_v62  ;;  %v3089_v1 = vsub.s32 0, %v3083_v57  ;;  %s2763_s16 = smov 112   ;;  %s2764_s2 = smov 48  }
  0x42   : > { %2406 = vmatpush3.bf16.msra.mxu0 %v2606_v18  ;;  %s3408_s26 = scalar_lea.vmem %s3407_s27, %s2957_s19  ;;  %v3091_v4 = vsel %vm865_vm5, 0.0, %v2760_v60  ;;  %s3412_s27 = sld [smem:[#allocation17_spill]] }
  0x43   : > { %901 = vadd.xlane.f32.xlu0 %v900_v5  ;;  %2411 = vmatprep.subr.bf16.mxu0 %v2756_v17  ;;  %v2302_v27 = vld [vmem:[%s3408_s26] ss:$0 sm:$0xff]  ;;  %s3410_s15 = scalar_lea.vmem %s3409_s14, %s2957_s19  ;;  %v875_v59 = vsub.s32 %v872_v58, %v3083_v57  ;;  %s2765_s26 = smov 16  }
  0x44   : > { %v2303_v31 = vld [vmem:[%s3410_s15] ss:$0 sm:$0xff]  ;;  %s3413_s14 = scalar_lea.vmem %s3345_s7, %s2957_s19  ;;  %p2339_p2 = scmp.ne.s32.totalorder %s2738_s24, 1 }
  0x45   : > { %v876_v63 = vrot.slane %v868_v61, %v875_v59  ;;  %vm1854_vm8 = vcmask (!%p2339_p2), 58368   ;;  %vm2767_vm9 = vmmov (!%p2339_p2), 0  }
  0x47   : > { %v884_v0 = vrot.slane %v876_v63, %v875_v59 }
  0x49   : > { %v3094_v5 = vrot.slane %v884_v0, %v3089_v1 }
  0xcc   : > { %v899_v6 = vpop.xlane.xlu0 %898 }
  0xcd   : > { %v904_v7 = vmul.f32 0.03125, %v899_v6  ;;  %v877_v6 = vcombine.high %v876_v63, %v876_v63 }
  0xcf   : > { %v906_v8 = vsub.f32 %v3018_v2, %v904_v7 }
  0xd0   : > { %v902_v9 = vpop.xlane.xlu0 %901 }
  0xd1   : > { %v905_v10 = vmul.f32 0.03125, %v902_v9  ;;  %v908_v11 = vmul.f32 %v906_v8, %v906_v8 }
  0xd3   : > { %v907_v12 = vsub.f32 %v3020_v3, %v905_v10  ;;  %v910_v13 = vsel %vm896_vm1, %v908_v11, 0.0 }
  0xd4   : > { %911 = vadd.xlane.f32.xlu1 %v910_v13  ;;  %v891_v13 = vrot.slane %v877_v6, %v875_v59 }
  0xd5   : > { %v909_v14 = vmul.f32 %v907_v12, %v907_v12 }
  0xd7   : > { %v913_v15 = vsel %vm896_vm1, %v909_v14, 0.0 }
  0xd8   : > { %914 = vadd.xlane.f32.xlu1 %v913_v15  ;;  %v3100_v15 = vrot.slane %v891_v13, %v3089_v1 }
 0x161   : > { %v912_v19 = vpop.xlane.xlu1 %911 }
 0x162   : > { %v916_v20 = vmul.f32 0.03125, %v912_v19 }
 0x164   : > { %v918_v21 = vadd.f32 1e-05, %v916_v20 }
 0x165   : > { %v915_v22 = vpop.xlane.xlu1 %914 }
 0x166   : > { %2619 = vrsqrt.f32 %v918_v21  ;;  %v917_v23 = vmul.f32 0.03125, %v915_v22 }
 0x168   : > { %v919_v24 = vadd.f32 1e-05, %v917_v23 }
 0x16a   : > { %2621 = vrsqrt.f32 %v919_v24 }
 0x170   : > { %v2620_v25 = vpop.eup %2619 }
 0x171   : > { %v922_v26 = vmul.f32 %v2620_v25, %v906_v8 }
 0x173   : > { %v930_v30 = vmul.f32 %v2302_v27, %v922_v26 }
 0x174   : > { %v2622_v28 = vpop.eup %2621 }
 0x175   : > { %v923_v29 = vmul.f32 %v2622_v28, %v907_v12  ;;  %v938_v33 = vadd.f32 %v2303_v31, %v930_v30 }
 0x177   : > { %v931_v32 = vmul.f32 %v2302_v27, %v923_v29 }
 0x179   : > { %v939_v34 = vadd.f32 %v2303_v31, %v931_v32 }
 0x17b   : > { %v940_v35 = vpack.c.bf16 %v939_v34, %v938_v33 }
 0x17d   : > { %2408 = vmatmul.mubr.msk.bf16.vlgmr.msra.gmra.mrb[0].mxu0 %vm896_vm1, %v940_v35 }
 0x17e   : > { %2413 = vmatprep.mubr.msk.bf16.mxu0 %vm2757_vm2, %v2756_v17 }
 0x250   : > { %v1001_v37 = vpop.f32.mrb[0].mxu0 }
 0x251   : > { %v1002_v38 = vadd.f32 %v2304_v36, %v1001_v37  ;;  %v2409_v39 = vpop.f32.mrb[1].mxu0 }
 0x252   : > { %v1004_v40 = vpop.f32.mrb[2].mxu0 }
 0x253   : > { %v3058_v41 = vpack.c.bf16 %v1002_v38, %v1002_v38  ;;  %v1005_v42 = vadd.f32 %v2304_v36, %v1004_v40  ;;  %v2410_v43 = vpop.f32.mrb[3].mxu0  ;;  %v1008_v47 = vmul.f32 0.25, %v1002_v38 }
 0x255   : > { %v3060_v44 = vpack.c.bf16 %v1005_v42, %v1005_v42  ;;  %1021 = vrot.lane.b32.xlu0 %v3058_v41, %s2758_s25  ;;  %v3066_v49 = vpack.c.bf16 %v1008_v47, %v1008_v47  ;;  %v1009_v51 = vmul.f32 0.25, %v1005_v42 }
 0x257   : > { %1071 = vrot.lane.b32.xlu1 %v3060_v44, %s2758_s25  ;;  %v3074_v52 = vpack.c.bf16 %v1009_v51, %v1009_v51 }
 0x2c7   : > { %v1022_v45 = vpop.permute.xlu0 %1021 }
 0x2c8   : > { %v1028_v46 = vsel %vm1023_vm3, %v1022_v45, 0 }
 0x2c9   : > { %2412 = vmatpush3.bf16.xpose.msra.mxu0 %v1028_v46  ;;  %v1072_v48 = vpop.permute.xlu1 %1071 }
 0x2ca   : > { %2417 = vmatprep.subr.bf16.mxu0 %v2756_v17  ;;  %v1077_v50 = vsel %vm1023_vm3, %v1072_v48, 0 }
 0x2d0   : > { %2414 = vmatmul.mubr.msk.bf16.vlgmr.msra.gmra.mrb[4].mxu0 %vm1023_vm3, %v3066_v49 }
 0x2d1   : > { %2418 = vmatpush3.bf16.xpose.msra.mxu0 %v1077_v50  ;;  %2419 = vmatprep.mubr.msk.bf16.mxu0 %vm2757_vm2, %v2756_v17 }
 0x2d2   : > { %2429 = vmatprep.subr.bf16.mxu0 %v2756_v17 }
 0x2d8   : > { %2420 = vmatmul.mubr.msk.bf16.vlgmr.msra.gmra.mrb[8].mxu0 %vm1023_vm3, %v3074_v52 }
 0x2d9   : > { %2431 = vmatprep.mubr.msk.bf16.mxu0 %vm2757_vm2, %v2756_v17 }
 0x3a3   : > { %v1064_v7 = vpop.f32.mrb[4].mxu0 }
 0x3a4   : > { %v1065_v8 = vadd.f32 %v1064_v7, %v3091_v4  ;;  %v2415_v9 = vpop.f32.mrb[5].mxu0 }
 0x3a5   : > { %v1067_v10 = vpop.f32.mrb[6].mxu0 }
 0x3a6   : > { %v2416_v11 = vpop.f32.mrb[7].mxu0  ;;  %v1129_v12 = vadd.f32 %v3094_v5, %v1065_v8 }
 0x3a8   : > { %v1132_v14 = vsel %vm1131_vm6, %v1129_v12, -inf }
 0x3a9   : > { %1133 = vmax.xlane.f32.xlu1 %v1132_v14 }
 0x3ab   : > { %v1113_v16 = vpop.f32.mrb[8].mxu0 }
 0x3ac   : > { %v1114_v18 = vadd.f32 %v1113_v16, %v3091_v4  ;;  %v2421_v19 = vpop.f32.mrb[9].mxu0 }
 0x3ad   : > { %v1116_v20 = vpop.f32.mrb[10].mxu0 }
 0x3ae   : > { %v2422_v21 = vpop.f32.mrb[11].mxu0  ;;  %v1130_v22 = vadd.f32 %v3100_v15, %v1114_v18 }
 0x3b0   : > { %v1135_v23 = vsel %vm1131_vm6, %v1130_v22, -inf }
 0x3b1   : > { %1136 = vmax.xlane.f32.xlu0 %v1135_v23 }
 0x3ba   : > { %1205 = vrot.lane.b32.xlu1 %v3060_v44, %s2761_s30 }
 0x3be   : > { %1255 = vrot.lane.b32.xlu1 %v3058_v41, %s2762_s29 }
 0x436   : > { %v1134_v24 = vpop.xlane.xlu1 %1133 }
 0x437   : > { %v1138_v25 = vsub.f32 %v1129_v12, %v1134_v24 }
 0x439   : > { %v1140_v26 = vmul.f32 1.442695, %v1138_v25 }
 0x43a   : > { %v1206_v27 = vpop.permute.xlu1 %1205 }
 0x43b   : > { %2623 = vpow2.f32 %v1140_v26  ;;  %v1211_v28 = vsel %vm1161_vm7, %v1206_v27, 0 }
 0x43c   : > { %2430 = vmatpush3.bf16.msra.mxu0 %v1211_v28 }
 0x43d   : > { %2441 = vmatprep.subr.bf16.mxu0 %v2756_v17 }
 0x43e   : > { %v1137_v29 = vpop.xlane.xlu0 %1136  ;;  %v1256_v37 = vpop.permute.xlu1 %1255 }
 0x43f   : > { %v1139_v30 = vsub.f32 %v1130_v22, %v1137_v29  ;;  %v1261_v46 = vsel %vm1023_vm3, %v1256_v37, 0 }
 0x441   : > { %v1142_v31 = vmul.f32 1.442695, %v1139_v30 }
 0x443   : > { %2625 = vpow2.f32 %v1142_v31 }
 0x445   : > { %v2624_v32 = vpop.eup %2623 }
 0x446   : > { %v1144_v33 = vsel %vm1131_vm6, %v2624_v32, 0.0 }
 0x447   : > { %1145 = vadd.xlane.f32.xlu0 %v1144_v33 }
 0x44d   : > { %v2626_v34 = vpop.eup %2625 }
 0x44e   : > { %v1147_v35 = vsel %vm1131_vm6, %v2626_v34, 0.0 }
 0x44f   : > { %1148 = vadd.xlane.f32.xlu1 %v1147_v35 }
 0x45d   : > { %1156 = vrot.lane.b32.xlu0 %v3058_v41, %s2761_s30  ;;  %s3420_s30 = sld [smem:[#allocation29_spill]] (!%p2339_p2) }
 0x460   : > { %1305 = vrot.lane.b32.xlu1 %v3060_v44, %s2762_s29 }
 0x461   : > { %1253 = vrot.lane.b32.xlu0 %v3066_v49, %s2763_s16 }
 0x464   : > { %1303 = vrot.lane.b32.xlu1 %v3074_v52, %s2763_s16 }
 0x4d4   : > { %v1146_v36 = vpop.xlane.xlu0 %1145 }
 0x4d5   : > { %2627 = vrcp.f32 %v1146_v36 }
 0x4d8   : > { %v1157_v38 = vpop.permute.xlu0 %1156 }
 0x4d9   : > { %v1163_v39 = vsel %vm1161_vm7, %v1157_v38, 0  ;;  %v2607_v38 = vld [vmem:[%s3412_s27] sm:$0xff]  }
 0x4da   : > { %2424 = vmatpush3.bf16.msra.mxu1 %v1163_v39  ;;  %v2608_v39 = vld [vmem:[%s3412_s27 + $0x8] sm:$0xff]  }
 0x4db   : > { %2435 = vmatprep.subr.bf16.mxu1 %v2756_v17 }
 0x4dc   : > { %v1149_v40 = vpop.xlane.xlu1 %1148  ;;  %v1254_v51 = vpop.permute.xlu0 %1253 }
 0x4dd   : > { %2629 = vrcp.f32 %v1149_v40 }
 0x4df   : > { %v2628_v42 = vpop.eup %2627 }
 0x4e0   : > { %v1152_v43 = vmul.f32 %v2628_v42, %v2624_v32  ;;  %v1306_v49 = vpop.permute.xlu1 %1305 }
 0x4e1   : > { %v1311_v52 = vsel %vm1023_vm3, %v1306_v49, 0 }
 0x4e2   : > { %v1154_v45 = vpack.c.bf16 %v1152_v43, %v1152_v43 }
 0x4e4   : > { %2426 = vmatmul.mubr.msk.bf16.vlgmr.msra.gmra.mrb[0].mxu1 %vm1131_vm6, %v1154_v45  ;;  %v1304_v53 = vpop.permute.xlu1 %1303 }
 0x4e5   : > { %2436 = vmatpush3.bf16.xpose.msra.mxu1 %v1261_v46  ;;  %2437 = vmatprep.mubr.msk.bf16.mxu1 %vm2757_vm2, %v2756_v17 }
 0x4e6   : > { %2447 = vmatprep.subr.bf16.mxu1 %v2756_v17 }
 0x4e7   : > { %v2630_v47 = vpop.eup %2629 }
 0x4e8   : > { %v1153_v48 = vmul.f32 %v2630_v47, %v2626_v34 }
 0x4ea   : > { %v1155_v50 = vpack.c.bf16 %v1153_v48, %v1153_v48 }
 0x4ec   : > { %2432 = vmatmul.mubr.msk.bf16.vlgmr.msra.gmra.mrb[12].mxu0 %vm1131_vm6, %v1155_v50  ;;  %2438 = vmatmul.mubr.msk.bf16.vlgmr.msra.gmra.mrb[4].mxu1 %vm1023_vm3, %v1254_v51 }
 0x4ed   : > { %2442 = vmatpush3.bf16.xpose.msra.mxu0 %v1311_v52  ;;  %2443 = vmatprep.mubr.msk.bf16.mxu0 %vm2757_vm2, %v2756_v17 }
 0x4ee   : > { %2453 = vmatprep.subr.bf16.mxu0 %v2756_v17  ;;  %2449 = vmatprep.mubr.msk.bf16.mxu1 %vm2757_vm2, %v2756_v17 }
 0x4f4   : > { %2444 = vmatmul.mubr.msk.bf16.vlgmr.msra.gmra.mrb[16].mxu0 %vm1023_vm3, %v1304_v53 }
 0x4f5   : > { %2455 = vmatprep.mubr.msk.bf16.mxu0 %vm2757_vm2, %v2756_v17 }
 0x5b7   : > { %v3133_v54 = vpop.f32.mrb[0].mxu1 }
 0x5b8   : > { %v2427_v55 = vpop.f32.mrb[1].mxu1 }
 0x5b9   : > { %v1202_v58 = vpop.f32.mrb[2].mxu1 }
 0x5ba   : > { %v2428_v59 = vpop.f32.mrb[3].mxu1 }
 0x5bf   : > { %v3135_v60 = vpop.f32.mrb[12].mxu0  ;;  %v1297_v61 = vpop.f32.mrb[4].mxu1 }
 0x5c0   : > { %v1298_v62 = vadd.f32 %v1297_v61, %v3091_v4  ;;  %v2433_v63 = vpop.f32.mrb[13].mxu0  ;;  %v2439_v0 = vpop.f32.mrb[5].mxu1 }
 0x5c1   : > { %v1250_v6 = vpop.f32.mrb[14].mxu0  ;;  %v1300_v7 = vpop.f32.mrb[6].mxu1 }
 0x5c2   : > { %v2434_v8 = vpop.f32.mrb[15].mxu0  ;;  %v2440_v9 = vpop.f32.mrb[7].mxu1  ;;  %v1353_v10 = vadd.f32 %v1298_v62, %v3094_v5  ;;  %v2323_v62 = vld [vmem:[%s3413_s14] ss:$0 sm:$0xff]  ;;  %s3416_s14 = sld [smem:[#allocation24_spill]] (!%p2339_p2) }
 0x5c4   : > { %v1355_v11 = vsel %vm1131_vm6, %v1353_v10, -inf }
 0x5c5   : > { %1356 = vmax.xlane.f32.xlu0 %v1355_v11 }
 0x5c7   : > { %v1347_v12 = vpop.f32.mrb[16].mxu0 }
 0x5c8   : > { %v1348_v13 = vadd.f32 %v1347_v12, %v3091_v4  ;;  %v2445_v14 = vpop.f32.mrb[17].mxu0 }
 0x5c9   : > { %v1350_v16 = vpop.f32.mrb[18].mxu0 }
 0x5ca   : > { %v2446_v18 = vpop.f32.mrb[19].mxu0  ;;  %v1354_v19 = vadd.f32 %v1348_v13, %v3100_v15 }
 0x5cc   : > { %v1358_v20 = vsel %vm1131_vm6, %v1354_v19, -inf }
 0x5cd   : > { %1359 = vmax.xlane.f32.xlu1 %v1358_v20 }
 0x5de   : > { %1427 = vrot.lane.b32.xlu1 %v3060_v44, %s2764_s2 }
 0x652   : > { %v1357_v21 = vpop.xlane.xlu0 %1356 }
 0x653   : > { %v1361_v22 = vsub.f32 %v1353_v10, %v1357_v21  ;;  %v2609_v21 = vld [vmem:[%s2997_s21] sm:$0xff]  }
 0x655   : > { %v1363_v5 = vmul.f32 1.442695, %v1361_v22  ;;  %v2610_v22 = vld [vmem:[%s2997_s21 + $0x8] sm:$0xff]   ;;  %s3417_s21 = sld [smem:[#allocation25_spill]] (!%p2339_p2) }
 0x657   : > { %2631 = vpow2.f32 %v1363_v5 }
 0x65a   : > { %v1360_v23 = vpop.xlane.xlu1 %1359 }
 0x65b   : > { %v1362_v24 = vsub.f32 %v1354_v19, %v1360_v23 }
 0x65d   : > { %v1365_v25 = vmul.f32 1.442695, %v1362_v24 }
 0x65e   : > { %v1428_v26 = vpop.permute.xlu1 %1427 }
 0x65f   : > { %2633 = vpow2.f32 %v1365_v25  ;;  %v1433_v4 = vsel %vm1161_vm7, %v1428_v26, 0 }
 0x660   : > { %2454 = vmatpush3.bf16.msra.mxu0 %v1433_v4 }
 0x661   : > { %v2632_v27 = vpop.eup %2631  ;;  %2467 = vmatprep.subr.bf16.mxu0 %v2756_v17 }
 0x662   : > { %v1367_v15 = vsel %vm1131_vm6, %v2632_v27, 0.0 }
 0x663   : > { %1368 = vadd.xlane.f32.xlu0 %v1367_v15 }
 0x669   : > { %v2634_v28 = vpop.eup %2633 }
 0x66a   : > { %v1370_v44 = vsel %vm1131_vm6, %v2634_v28, 0.0 }
 0x66b   : > { %1371 = vadd.xlane.f32.xlu0 %v1370_v44 }
 0x681   : > { %1379 = vrot.lane.b32.xlu0 %v3058_v41, %s2764_s2 }
 0x6f0   : > { %v1369_v29 = vpop.xlane.xlu0 %1368 }
 0x6f1   : > { %2635 = vrcp.f32 %v1369_v29 }
 0x6f8   : > { %v1372_v30 = vpop.xlane.xlu0 %1371 }
 0x6f9   : > { %2637 = vrcp.f32 %v1372_v30 }
 0x6fb   : > { %v2636_v31 = vpop.eup %2635 }
 0x6fc   : > { %v1375_v32 = vmul.f32 %v2636_v31, %v2632_v27  ;;  %v1380_v33 = vpop.permute.xlu0 %1379  ;;  %v2325_v31 = vld [vmem:[%s3414_s20] ss:$0 sm:$0xff] }
 0x6fd   : > { %v1385_v34 = vsel %vm1161_vm7, %v1380_v33, 0 }
 0x6fe   : > { %2448 = vmatpush3.bf16.msra.mxu1 %v1385_v34  ;;  %v1377_v35 = vpack.c.bf16 %v1375_v32, %v1375_v32 }
 0x6ff   : > { %2459 = vmatprep.subr.bf16.mxu1 %v2756_v17 }
 0x701   : > { %2450 = vmatmul.mubr.msk.bf16.vlgmr.msra.gmra.mrb[8].mxu1 %vm1131_vm6, %v1377_v35 }
 0x702   : > { %2463 = vmatprep.mubr.msk.bf16.mxu1 %vm2757_vm2, %v2756_v17  ;;  %2460 = vmatpush3.bf16.msra.mxu1 %v2607_v38  ;;  %v2614_v38 = vld [vmem:[%s3007_s23 + $0x18] sm:$0xff]  }
 0x703   : > { %v2638_v41 = vpop.eup %2637  ;;  %2461 = vmatprep.subr.bf16.mxu1 %v2756_v17 }
 0x704   : > { %v1376_v36 = vmul.f32 %v2638_v41, %v2634_v28  ;;  %v2324_v28 = vld [vmem:[%s830_s3] ss:$0 sm:$0xff]  ;;  %s3418_s3 = sld [smem:[#allocation28_spill]] (!%p2339_p2) }
 0x705   : > { %v2611_v41 = vld [vmem:[%s3007_s23] sm:$0xff]  }
 0x706   : > { %v1378_v37 = vpack.c.bf16 %v1376_v36, %v1376_v36  ;;  %2462 = vmatpush3.bf16.msra.mxu1 %v2608_v39  ;;  %v2612_v36 = vld [vmem:[%s3007_s23 + $0x8] sm:$0xff]   ;;  %v2615_v39 = vld [vmem:[%s3007_s23 + $0x20] sm:$0xff]  }
 0x707   : > { %2475 = vmatprep.subr.bf16.mxu1 %v2756_v17 }
 0x708   : > { %2456 = vmatmul.mubr.msk.bf16.vlgmr.msra.gmra.mrb[20].mxu0 %vm1131_vm6, %v1378_v37  ;;  %v2613_v37 = vld [vmem:[%s3007_s23 + $0x10] sm:$0xff]  }
 0x709   : > { %2471 = vmatprep.mubr.msk.bf16.mxu0 %vm2757_vm2, %v2756_v17  ;;  %2468 = vmatpush3.bf16.msra.mxu0 %v2609_v21 }
 0x70a   : > { %2469 = vmatprep.subr.bf16.mxu0 %v2756_v17 }
 0x70d   : > { %2470 = vmatpush3.bf16.msra.mxu0 %v2610_v22 }
 0x7d4   : > { %v1421_v40 = vpop.f32.mrb[8].mxu1 }
 0x7d5   : > { %v2451_v42 = vpop.f32.mrb[9].mxu1 }
 0x7d6   : > { %v1424_v43 = vpop.f32.mrb[10].mxu1  ;;  %v2617_v42 = vld [vmem:[%s3007_s23 + $0x30] sm:$0xff]  }
 0x7d7   : > { %v2452_v45 = vpop.f32.mrb[11].mxu1  ;;  %v2618_v43 = vld [vmem:[%s3007_s23 + $0x38] sm:$0xff]  }
 0x7d8   : > { %v2326_v45 = vld [vmem:[%s841_s6] ss:$0 sm:$0xff] }
 0x7db   : > { %v1469_v46 = vpop.f32.mrb[20].mxu0 }
 0x7dc   : > { %v2600_v47 = vpack.i.bf16 %v1469_v46, %v1421_v40  ;;  %v2457_v48 = vpop.f32.mrb[21].mxu0  ;;  %v2616_v40 = vld [vmem:[%s3007_s23 + $0x28] sm:$0xff]   ;;  %s3419_s23 = sld [smem:[#allocation27_spill]] (!%p2339_p2) }
 0x7dd   : > { %v1472_v49 = vpop.f32.mrb[22].mxu0 }
 0x7de   : > { %v2458_v50 = vpop.f32.mrb[23].mxu0  ;;  %2601 = vrot.lane.b32.xlu1 %v2600_v47, %s2765_s26 }
 0x850   : > { %v2602_v51 = vpop.permute.xlu1 %2601 }
 0x851   : > { %v2604_v52 = vunpack.i.h.bf16 %v2602_v51  ;;  %v2603_v53 = vunpack.i.l.bf16 %v2602_v51 }
 0x853   : > { %v1484_v55 = vsel %vm1023_vm3, %v3135_v60, %v2604_v52  ;;  %v1483_v58 = vsel %vm1023_vm3, %v3133_v54, %v2603_v53 }
 0x854   : > { %v1485_v59 = vpack.c.bf16 %v1484_v55, %v1483_v58 }
 0x856   : > { %2464 = vmatmul.mubr.msk.bf16.vlgmr.msra.gmra.mrb[12].mxu1 %vm896_vm1, %v1485_v59 }
 0x857   : > { %2491 = vmatprep.mubr.msk.bf16.mxu1 %vm2757_vm2, %v2756_v17  ;;  %2476 = vmatpush3.bf16.msra.mxu1 %v2611_v41 }
 0x858   : > { %2477 = vmatprep.subr.bf16.mxu1 %v2756_v17 }
 0x85b   : > { %2478 = vmatpush3.bf16.msra.mxu1 %v2612_v36 }
 0x85c   : > { %2479 = vmatprep.subr.bf16.mxu1 %v2756_v17 }
 0x85f   : > { %2480 = vmatpush3.bf16.msra.mxu1 %v2613_v37 }
 0x860   : > { %2481 = vmatprep.subr.bf16.mxu1 %v2756_v17 }
 0x863   : > { %2482 = vmatpush3.bf16.msra.mxu1 %v2614_v38 }
 0x864   : > { %2483 = vmatprep.subr.bf16.mxu1 %v2756_v17 }
 0x867   : > { %2484 = vmatpush3.bf16.msra.mxu1 %v2615_v39 }
 0x868   : > { %2485 = vmatprep.subr.bf16.mxu1 %v2756_v17 }
 0x86b   : > { %2486 = vmatpush3.bf16.msra.mxu1 %v2616_v40 }
 0x86c   : > { %2487 = vmatprep.subr.bf16.mxu1 %v2756_v17 }
 0x86f   : > { %2488 = vmatpush3.bf16.msra.mxu1 %v2617_v42 }
 0x870   : > { %2489 = vmatprep.subr.bf16.mxu1 %v2756_v17 }
 0x873   : > { %2490 = vmatpush3.bf16.msra.mxu1 %v2618_v43  ;;  %v2340_v43 = vld [vmem:[%s3416_s14] ss:$0 sm:$0xff] (!%p2339_p2) }
 0x929   : > { %v1539_v61 = vpop.f32.mrb[12].mxu1 }
 0x92a   : > { %v1546_v63 = vadd.f32 %v1539_v61, %v3018_v2  ;;  %v2465_v0 = vpop.f32.mrb[13].mxu1 }
 0x92b   : > { %v1542_v6 = vpop.f32.mrb[14].mxu1 }
 0x92c   : > { %v3174_v60 = vadd.f32 %v2323_v62, %v1546_v63  ;;  %v1547_v54 = vadd.f32 %v1542_v6, %v3020_v3  ;;  %v2466_v7 = vpop.f32.mrb[15].mxu1 }
 0x92e   : > { %v3177_v8 = vadd.f32 %v2323_v62, %v1547_v54  ;;  %v1559_v9 = vsel %vm896_vm1, %v3174_v60, 0.0 }
 0x92f   : > { %1560 = vadd.xlane.f32.xlu1 %v1559_v9 }
 0x930   : > { %v1562_v10 = vsel %vm896_vm1, %v3177_v8, 0.0 }
 0x931   : > { %1563 = vadd.xlane.f32.xlu0 %v1562_v10 }
 0x9bc   : > { %v1561_v2 = vpop.xlane.xlu1 %1560 }
 0x9bd   : > { %v1565_v11 = vmul.f32 0.03125, %v1561_v2 }
 0x9be   : > { %v1564_v12 = vpop.xlane.xlu0 %1563 }
 0x9bf   : > { %v1567_v13 = vsub.f32 %v3174_v60, %v1565_v11  ;;  %v1566_v14 = vmul.f32 0.03125, %v1564_v12 }
 0x9c1   : > { %v1568_v3 = vsub.f32 %v3177_v8, %v1566_v14  ;;  %v1569_v16 = vmul.f32 %v1567_v13, %v1567_v13 }
 0x9c3   : > { %v1571_v18 = vsel %vm896_vm1, %v1569_v16, 0.0  ;;  %v1570_v19 = vmul.f32 %v1568_v3, %v1568_v3 }
 0x9c4   : > { %1572 = vadd.xlane.f32.xlu0 %v1571_v18 }
 0x9c5   : > { %v1574_v20 = vsel %vm896_vm1, %v1570_v19, 0.0 }
 0x9c8   : > { %1575 = vadd.xlane.f32.xlu0 %v1574_v20 }
 0xa51   : > { %v1573_v5 = vpop.xlane.xlu0 %1572 }
 0xa52   : > { %v1577_v23 = vmul.f32 0.03125, %v1573_v5 }
 0xa54   : > { %v1579_v24 = vadd.f32 1e-05, %v1577_v23 }
 0xa55   : > { %v1576_v25 = vpop.xlane.xlu0 %1575 }
 0xa56   : > { %2639 = vrsqrt.f32 %v1579_v24  ;;  %v1578_v26 = vmul.f32 0.03125, %v1576_v25 }
 0xa58   : > { %v1580_v4 = vadd.f32 1e-05, %v1578_v26 }
 0xa5a   : > { %2641 = vrsqrt.f32 %v1580_v4 }
 0xa60   : > { %v2640_v27 = vpop.eup %2639 }
 0xa61   : > { %v1583_v15 = vmul.f32 %v2640_v27, %v1567_v13 }
 0xa63   : > { %v1591_v29 = vmul.f32 %v2324_v28, %v1583_v15 }
 0xa64   : > { %v2642_v44 = vpop.eup %2641 }
 0xa65   : > { %v1584_v30 = vmul.f32 %v2642_v44, %v1568_v3  ;;  %v1599_v33 = vadd.f32 %v2325_v31, %v1591_v29  ;;  %v2338_v3 = vld [vmem:[%s849_s4] ss:$0 sm:$0xff]  ;;  %s3415_s4 = sld [smem:[#allocation26_spill]] (!%p2339_p2) }
 0xa67   : > { %v1592_v32 = vmul.f32 %v2324_v28, %v1584_v30 }
 0xa69   : > { %v1600_v34 = vadd.f32 %v2325_v31, %v1592_v32 }
 0xa6b   : > { %v1601_v35 = vpack.c.bf16 %v1600_v34, %v1599_v33  ;;  %v2647_v33 = vld [vmem:[%s3415_s4] sm:$0xff] (!%p2339_p2)   ;;  %v2766_v34 = vmov (!%p2339_p2), 0.0  }
 0xa6c   : > { %2503 = vmatprep.subr.bf16.mxu1 (!%p2339_p2), %v2766_v34  ;;  %2495 = vmatprep.subr.bf16.mxu0 (!%p2339_p2), %v2766_v34 }
 0xa6d   : > { %2472 = vmatmul.mubr.msk.bf16.vlgmr.msra.gmra.mrb[24].mxu0 %vm896_vm1, %v1601_v35  ;;  %v2648_v35 = vld [vmem:[%s3415_s4 + $0x10] sm:$0xff] (!%p2339_p2)  }
 0xa6e   : > { %2496 = vmatpush3.bf16.msra.mxu0 (!%p2339_p2), %v2648_v35  ;;  %2499 = vmatprep.mubr.msk.bf16.mxu0 (!%p2339_p2), %vm2767_vm9, %v2766_v34 }
 0xa6f   : > { %2497 = vmatprep.subr.bf16.mxu0 (!%p2339_p2), %v2766_v34 }
 0xb40   : > { %v1662_v46 = vpop.f32.mrb[24].mxu0 }
 0xb41   : > { %v1663_v47 = vadd.f32 %v2326_v45, %v1662_v46  ;;  %v2473_v48 = vpop.f32.mrb[25].mxu0  ;;  %v2341_v46 = vld [vmem:[%s3417_s21] ss:$0 sm:$0xff] (!%p2339_p2) }
 0xb42   : > { %v1665_v49 = vpop.f32.mrb[26].mxu0 }
 0xb43   : > { %v1671_v50 = vmul.f32 0.044715, %v1663_v47  ;;  %v1666_v51 = vadd.f32 %v2326_v45, %v1665_v49  ;;  %v2474_v52 = vpop.f32.mrb[27].mxu0  ;;  %v1669_v9 = vmul.f32 0.5, %v1663_v47 }
 0xb45   : > { %v1673_v53 = vmul.f32 %v1671_v50, %v1663_v47  ;;  %v1672_v55 = vmul.f32 0.044715, %v1666_v51  ;;  %v1670_v10 = vmul.f32 0.5, %v1666_v51 }
 0xb47   : > { %v1675_v58 = vmul.f32 %v1673_v53, %v1663_v47  ;;  %v1674_v59 = vmul.f32 %v1672_v55, %v1666_v51 }
 0xb49   : > { %v1677_v61 = vadd.f32 %v1675_v58, %v1663_v47  ;;  %v1676_v62 = vmul.f32 %v1674_v59, %v1666_v51 }
 0xb4b   : > { %v1679_v17 = vmul.f32 0.7978846, %v1677_v61  ;;  %v1678_v63 = vadd.f32 %v1676_v62, %v1666_v51 }
 0xb4d   : > { %2643 = vtanh.f32 %v1679_v17  ;;  %v1680_v0 = vmul.f32 0.7978846, %v1678_v63 }
 0xb4f   : > { %2645 = vtanh.f32 %v1680_v0 }
 0xb57   : > { %v2644_v6 = vpop.eup %2643 }
 0xb58   : > { %v1683_v54 = vadd.f32 1.0, %v2644_v6 }
 0xb59   : > { %v2646_v7 = vpop.eup %2645 }
 0xb5a   : > { %v1684_v2 = vadd.f32 1.0, %v2646_v7  ;;  %v1685_v11 = vmul.f32 %v1683_v54, %v1669_v9 }
 0xb5c   : > { %v1686_v12 = vmul.f32 %v1684_v2, %v1670_v10 }
 0xb5e   : > { %v1687_v13 = vpack.c.bf16 %v1686_v12, %v1685_v11 }
 0xb60   : > { %2492 = vmatmul.mubr.bf16.vlgmr.msra.gmra.mrb[16].mxu1 %v1687_v13 }
 0xb61   : > { %2504 = vmatpush3.bf16.msra.mxu1 (!%p2339_p2), %v2647_v33  ;;  %2507 = vmatprep.mubr.msk.bf16.mxu1 (!%p2339_p2), %vm2767_vm9, %v2766_v34 }
 0xb62   : > { %2505 = vmatprep.subr.bf16.mxu1 (!%p2339_p2), %v2766_v34 }
 0xc33   : > { %v1786_v14 = vpop.f32.mrb[16].mxu1 }
 0xc34   : > { %v1793_v16 = vadd.f32 %v1786_v14, %v3174_v60  ;;  %v2493_v18 = vpop.f32.mrb[17].mxu1  ;;  %1809 = sbr.rel (%p2339_p2) target bundleno = 3899 (0xf3b), region = 108  ;;  %v1855_v60 = vsel (!%p2339_p2), %vm1854_vm8, %v3081_v56, 0.0 }
 0xc35   : > { %v1789_v19 = vpop.f32.mrb[18].mxu1 }
 0xc36   : > { %v1802_v20 = vadd.f32 %v2338_v3, %v1793_v16  ;;  %v1794_v21 = vadd.f32 %v1789_v19, %v3177_v8  ;;  %v2494_v22 = vpop.f32.mrb[19].mxu1  ;;  %v1868_v8 = vsub.s32 (!%p2339_p2), 1, %v3083_v57  ;;  %v1862_v57 = vrot.slane (!%p2339_p2), %v3081_v56, %v3089_v1  ;;  %v2650_v1 = vld [vmem:[%s3415_s4 + $0x18] sm:$0xff] (!%p2339_p2)  }
 0xc37   : > { %2498 = vmatpush3.bf16.msra.mxu0 (!%p2339_p2), %v2650_v1 }
 0xc38   : > { %1804 = vst.msk [vmem:[#allocation2] sm:$0xff] %vm896_vm1, %v1802_v20  ;;  %v1803_v5 = vadd.f32 %v2338_v3, %v1794_v21  ;;  %v1812_v23 = vsel (!%p2339_p2), %vm896_vm1, %v1802_v20, 0.0  ;;  %v1869_v25 = vrot.slane (!%p2339_p2), %v3081_v56, %v1868_v8  ;;  %v2649_v56 = vld [vmem:[%s3415_s4 + $0x8] sm:$0xff] (!%p2339_p2)   ;;  %2511 = vmatprep.subr.bf16.mxu0 (!%p2339_p2), %v2766_v34 }
 0xc39   : > { %1813 = vadd.xlane.f32.xlu0 (!%p2339_p2), %v1812_v23  ;;  %2506 = vmatpush3.bf16.msra.mxu1 (!%p2339_p2), %v2649_v56  ;;  %v2651_v23 = vld [vmem:[%s3418_s3] sm:$0xff] (!%p2339_p2)  }
 0xc3a   : > { %1805 = vst.msk [vmem:[#allocation2 + $0x8] sm:$0xff] %vm896_vm1, %v1803_v5  ;;  %v1815_v24 = vsel (!%p2339_p2), %vm896_vm1, %v1803_v5, 0.0 }
 0xc3d   : > { %1816 = vadd.xlane.f32.xlu0 %v1815_v24 }
 0xc41   : > { %1856 = vadd.xlane.f32.xlu0 %v1855_v60 }
 0xc57   : > { %1871 = vbcast.lane.b32.xlu0 %v1869_v25, 256 }
 0xcc6   : > { %v1814_v26 = vpop.xlane.xlu0 %1813 }
 0xcc7   : > { %v1818_v4 = vmul.f32 0.03125, %v1814_v26 }
 0xcc9   : > { %v1820_v27 = vsub.f32 %v1802_v20, %v1818_v4  ;;  %v2017_v4 = vld [vmem:[%s3419_s23] sm:$0x1] }
 0xcca   : > { %v1817_v15 = vpop.xlane.xlu0 %1816 }
 0xccb   : > { %v1819_v28 = vmul.f32 0.03125, %v1817_v15  ;;  %v1822_v44 = vmul.f32 %v1820_v27, %v1820_v27 }
 0xccd   : > { %v1821_v29 = vsub.f32 %v1803_v5, %v1819_v28  ;;  %v1824_v30 = vsel %vm896_vm1, %v1822_v44, 0.0 }
 0xcce   : > { %1825 = vadd.xlane.f32.xlu1 %v1824_v30  ;;  %v1857_v47 = vpop.xlane.xlu0 %1856 }
 0xccf   : > { %v1823_v31 = vmul.f32 %v1821_v29, %v1821_v29  ;;  %v1858_v55 = vmax.f32 %v1857_v47, 1.0 }
 0xcd1   : > { %v1827_v32 = vsel %vm896_vm1, %v1823_v31, 0.0  ;;  %v1890_v63 = vrot.slane %v1858_v55, 1 }
 0xcd2   : > { %1828 = vadd.xlane.f32.xlu1 %v1827_v32  ;;  %v1872_v59 = vpop.permute.xlu0 %1871  ;;  %v2023_v32 = vld [vmem:[%s3420_s30] sm:$0x1] }
 0xce3   : > { %1864 = vbcast.lane.b32.xlu1 %v1862_v57, 256 }
 0xd5b   : > { %v1826_v41 = vpop.xlane.xlu1 %1825 }
 0xd5c   : > { %v1830_v36 = vmul.f32 0.03125, %v1826_v41 }
 0xd5e   : > { %v1832_v37 = vadd.f32 1e-05, %v1830_v36 }
 0xd5f   : > { %v1829_v38 = vpop.xlane.xlu1 %1828 }
 0xd60   : > { %2652 = vrsqrt.f32 %v1832_v37  ;;  %v1831_v39 = vmul.f32 0.03125, %v1829_v38 }
 0xd62   : > { %v1833_v40 = vadd.f32 1e-05, %v1831_v39 }
 0xd63   : > { %v1865_v50 = vpop.permute.xlu1 %1864 }
 0xd64   : > { %2654 = vrsqrt.f32 %v1833_v40 }
 0xd65   : > { %2656 = vrcp.f32 %v1858_v55 }
 0xd66   : > { %2658 = vrcp.f32 %v1890_v63 }
 0xd6a   : > { %v2653_v42 = vpop.eup %2652 }
 0xd6b   : > { %v1836_v45 = vmul.f32 %v2653_v42, %v1820_v27 }
 0xd6d   : > { %v1844_v48 = vmul.f32 %v2340_v43, %v1836_v45 }
 0xd6e   : > { %v2655_v49 = vpop.eup %2654 }
 0xd6f   : > { %v1852_v51 = vadd.f32 %v2341_v46, %v1844_v48  ;;  %v1837_v52 = vmul.f32 %v2655_v49, %v1821_v29  ;;  %v2657_v3 = vpop.eup %2656 }
 0xd70   : > { %v2659_v21 = vpop.eup %2658 }
 0xd71   : > { %v1873_v53 = vmul.f32 %v1865_v50, %v1852_v51  ;;  %v1845_v58 = vmul.f32 %v2340_v43, %v1837_v52 }
 0xd73   : > { %v1875_v61 = vsel %vm896_vm1, %v1873_v53, 0.0  ;;  %v1853_v62 = vadd.f32 %v2341_v46, %v1845_v58 }
 0xd74   : > { %v1876_v17 = vrot.slane %v1875_v61, 4 }
 0xd75   : > { %v1874_v0 = vmul.f32 %v1872_v59, %v1853_v62 }
 0xd76   : > { %v1877_v6 = vadd.f32 %v1876_v17, %v1875_v61 }
 0xd77   : > { %v1882_v54 = vsel %vm896_vm1, %v1874_v0, 0.0 }
 0xd78   : > { %v1878_v7 = vrot.slane %v1877_v6, 2  ;;  %v1883_v9 = vrot.slane %v1882_v54, 4 }
 0xd7a   : > { %v1879_v10 = vadd.f32 %v1878_v7, %v1877_v6  ;;  %v1884_v2 = vadd.f32 %v1883_v9, %v1882_v54 }
 0xd7c   : > { %v1880_v11 = vrot.slane %v1879_v10, 1  ;;  %v1885_v12 = vrot.slane %v1884_v2, 2 }
 0xd7e   : > { %v1881_v13 = vadd.f32 %v1880_v11, %v1879_v10  ;;  %v1886_v14 = vadd.f32 %v1885_v12, %v1884_v2 }
 0xd80   : > { %v1887_v16 = vrot.slane %v1886_v14, 1  ;;  %v1894_v18 = vmul.f32 %v2657_v3, %v1881_v13 }
 0xd82   : > { %v1888_v19 = vadd.f32 %v1887_v16, %v1886_v14  ;;  %v1897_v20 = vpack.c.bf16 %v1894_v18, %v1894_v18 }
 0xd84   : > { %2508 = vmatmul.mubr.msk.bf16.vlgmr.msra.gmra.mrb[0].mxu1 %vm896_vm1, %v1897_v20  ;;  %v1896_v22 = vmul.f32 %v2659_v21, %v1888_v19 }
 0xd86   : > { %v1898_v5 = vpack.c.bf16 %v1896_v22, %v1896_v22 }
 0xd88   : > { %2500 = vmatmul.mubr.msk.bf16.vlgmr.msra.gmra.mrb[0].mxu0 %vm896_vm1, %v1898_v5 }
 0xd89   : > { %2513 = vmatprep.mubr.msk.bf16.mxu0 %vm2767_vm9, %v2766_v34  ;;  %2512 = vmatpush3.bf16.msra.mxu0 %v2651_v23 }
 0xe57   : > { %v2011_v24 = vpop.f32.mrb[0].mxu1 }
 0xe58   : > { %v2509_v60 = vpop.f32.mrb[1].mxu1 }
 0xe59   : > { %v2014_v8 = vpop.f32.mrb[2].mxu1 }
 0xe5a   : > { %v2510_v25 = vpop.f32.mrb[3].mxu1 }
 0xe5b   : > { %v1956_v26 = vpop.f32.mrb[0].mxu0 }
 0xe5c   : > { %v2012_v27 = vadd.f32 %v2011_v24, %v1956_v26  ;;  %v2501_v15 = vpop.f32.mrb[1].mxu0 }
 0xe5d   : > { %v1959_v28 = vpop.f32.mrb[2].mxu0 }
 0xe5e   : > { %v2018_v44 = vadd.f32 %v2017_v4, %v2012_v27  ;;  %v2502_v29 = vpop.f32.mrb[3].mxu0 }
 0xe60   : > { %v2019_v30 = vmax.f32 %v2018_v44, 0.0 }
 0xe62   : > { %v2020_v31 = vpack.c.bf16 %v2019_v30, %v2019_v30 }
 0xe64   : > { %2514 = vmatmul.mubr.msk.bf16.vlgmr.msra.gmra.mrb[4].mxu0 %vm1023_vm3, %v2020_v31 }
 0xf37   : > { %v2067_v57 = vpop.f32.mrb[4].mxu0 }
 0xf38   : > { %v2068_v33 = vadd.f32 %v2067_v57, %v2023_v32  ;;  %v2515_v34 = vpop.f32.mrb[5].mxu0 }
 0xf39   : > { %v2070_v35 = vpop.f32.mrb[6].mxu0 }
 0xf3a   : > { %2073 = vst [vmem:[%s3015_s0] sm:$0x1] %v2068_v33  ;;  %v2516_v56 = vpop.f32.mrb[7].mxu0 }
 0xf3b PF: > { %s3421_s29 = sld [smem:[#allocation8_spill]]  ;;  %s2087_s14 = sshll.u32 %s3015_s0, 4  ;;  %s2088_s14 = int_to_ptr.vmem [resolvable:$true] %s2087_s14 }
 0xf3c   : > { %s3423_s17 = sld [smem:[#allocation30_spill]]  ;;  %s3424_s15 = sand.u32 1, %s2730_s22  }
 0xf3d   : > { %s2075_s1 = scalar_lea.sflag [#allocation4], %s3424_s15  ;;  %s2660_s21 = scalar_lea.vmem %s2088_s14, 16 }
 0xf3e   : > { %p2661_p4 = scmp.ne.s32.totalorder %s2088_s14, %s2660_s21  ;;  %s2768_s18 = smov [#allocation3]  }
 0xf3f   : > { %s2664_s20 = sshll.u32 %s2768_s18, 4  ;;  %s2665_s20 = int_to_ptr.vmem [resolvable:$false] %s2664_s20 }
 0xf40   : > { %p2662_p5 = pnand %p2661_p4, %p2923_p3  ;;  %s2666_s3 = scalar_lea.vmem %s2665_s20, 32 }
 0xf41   : > { %s2350_s2 = sshll.u32 %s3421_s29, 4  ;;  %p2667_p7 = scmp.lt.s32.totalorder %s2088_s14, %s2665_s20 }
 0xf42   : > { %s3288_s28 = scalar_lea.hbm %s3423_s17, %s2350_s2  ;;  %p2663_p6 = pneg %p2662_p5 }
 0xf43   : > { %p2668_p8 = scmp.lt.s32.totalorder %s2666_s3, %s2660_s21 }
 0xf45   : > { %p2669_p10 = por %p2668_p8, %p2667_p7 }
 0xf47   : > { %p2670_p11 = pnand %p2669_p10, %p2663_p6 }
 0xf49   : > { %2673 = shalt.err (!%p2670_p11)
}
 0xf4a   : > { %s2674_s0 = scalar_lea.hbm %s3288_s28, 16  ;;  %s2678_s23 = scalar_lea.hbm %s3423_s17, 32 }
 0xf4b   : > { %p2675_p12 = scmp.ne.s32.totalorder %s3288_s28, %s2674_s0  ;;  %p2679_p1 = scmp.lt.u32.totalorder %s3288_s28, %s3423_s17 }
 0xf4c   : > { %p2680_p2 = scmp.lt.u32.totalorder %s2678_s23, %s2674_s0  ;;  %p2682_p5 = scmp.lt.u32.totalorder %s2674_s0, %s3288_s28 }
 0xf4d   : > { %p2676_p13 = pnand %p2675_p12, %p2923_p3 }
 0xf4e   : > { %p2681_p4 = por %p2680_p2, %p2679_p1 }
 0xf4f   : > { %p2677_p0 = pneg %p2676_p13 }
 0xf50   : > { %p2683_p6 = por %p2682_p5, %p2681_p4 }
 0xf52   : > { %p2684_p7 = pnand %p2683_p6, %p2677_p0 }
 0xf54   : > { %2687 = shalt.err (!%p2684_p7)
}
 0xf55   : > { %2517 = dma.vmem_to_hbm [thread:$0]  (%p2923_p3), %s2088_s14, 16, %s3288_s28, %s2075_s1  }
 0xf56 PF: > { %s3425_s30 = sld [smem:[#allocation11_spill]]  ;;  %s3426_s29 = sld [smem:[#allocation6_spill]] }
 0xf5c   : > { %p2523_p8 = scmp.ge.s32.totalorder %s3425_s30, 2  ;;  %s2099_s27 = sand.u32 1, %s3426_s29  }
 0xf5d   : > { %s2100_s26 = scalar_lea.sflag [#allocation4], %s2099_s27 }
 0xf5e   : > { %p2520_p10 = pnand %p2523_p8, %p2933_p9 }
 0xf60   : > { %2721 = dma.done.wait (!%p2520_p10), %s2100_s26, 16  }
 0xf61   : > { %2723 = vsyncadd (!%p2520_p10), %s2100_s26, 4294967280  ;;  %s33_s26 = sadd.s32 1, %s3425_s30   ;;  %s3428_s15 = sld [smem:[#allocation7_spill]] }
 0xf62   : > { %p30_p11 = scmp.ge.s32.totalorder %s33_s26, 6   ;;  %s3429_s23 = sld [smem:[#allocation16_spill]] }
 0xf63   : > { %s3430_s24 = sld [smem:[#allocation9_spill]]  ;;  %s3431_s2 = sld [smem:[#allocation10_spill]] }
 0xf64   : > { %s3432_s25 = sld [smem:[#allocation12_spill]]  ;;  %s3433_s3 = sld [smem:[#allocation14_spill]] }
 0xf65   : > { %s3434_s1 = smov %s2730_s22  ;;  %32 = sbr.rel (!%p30_p11) target bundleno = 19 (0x13), region = 182 }
 0xf67   : > { %s3435_s22 = smov %s3428_s15 }
 0xf6c   :  { %2104 = vsyncpa [#allocation4], 1 }
 0xf6d   :  { %2106 = vsyncpa [#allocation4 + $0x1], 1 }

</bundles_post_ra>
